<compile_context>
chip_gen: v5e
topology: v5e:2x2
jax: 0.10.0
libtpu: 0.0.40
codegen_flags: <defaults>
</compile_context>

<pallas_src>
import functools

import jax
import jax.numpy as jnp
from jax.experimental import pallas as pl
from jax.experimental.pallas import tpu as pltpu


# ----------------------------------------------------------------------------
# Tile-size policy.  Caps chosen for v5e/v6e (128 MiB VMEM); on v7x (64 MiB)
# halve ROW/LANE caps.  Lane-dim tiles are kept 128-aligned, row tiles
# 8-aligned; the helper falls back to the full dim (always legal).
# ----------------------------------------------------------------------------
ROW_TILE_CAP = 256      # rows of B*S presented to the MXU per block
LANE_TILE_CAP = 512     # output-column tile (lane dim, 128-aligned)
K_TILE_CAP = 512        # reduction tile for the LM head
FF_TILE_CAP = 512       # FFN-dim tile for the fused MLP
ATTN_Q_TILE = 128
ATTN_KV_TILE = 128
VMEM_LIMIT_BYTES = 64 * 1024 * 1024


def _divisor_tile(dim, cap, align):
    """Largest t <= cap with dim % t == 0 and t % align == 0, else full dim."""
    if dim <= cap:
        return dim
    t = (cap // align) * align
    while t >= align:
        if dim % t == 0:
            return t
        t -= align
    return dim


def _cparams(dims):
    return pltpu.CompilerParams(dimension_semantics=dims,
                                vmem_limit_bytes=VMEM_LIMIT_BYTES)


# ----------------------------------------------------------------------------
# Fused LayerNorm -> Linear (used for the fused QKV projection)
# ----------------------------------------------------------------------------

def _ln_linear_kernel(x_ref, g_ref, bln_ref, w_ref, b_ref, o_ref, hln_ref):
    # LayerNorm once per row-block (j == 0), cached in VMEM scratch (bf16).
    @pl.when(pl.program_id(1) == 0)
    def _():
        xv = x_ref[...].astype(jnp.float32)
        mu = jnp.mean(xv, axis=-1, keepdims=True)
        xc = xv - mu
        var = jnp.mean(xc * xc, axis=-1, keepdims=True)
        inv = jax.lax.rsqrt(var + 1e-5)
        hln_ref[...] = (xc * inv * g_ref[...] + bln_ref[...]).astype(hln_ref.dtype)

    o_ref[...] = (jnp.dot(hln_ref[...], w_ref[...],
                          preferred_element_type=jnp.float32)
                  + b_ref[...]).astype(o_ref.dtype)


def ln_linear(x, gamma, beta, w, b):
    """y = LayerNorm(x) @ w + b   with x:(M,D) bf16, w:(D,N) bf16 -> (M,N) bf16."""
    M, D = x.shape
    _, N = w.shape
    tm = _divisor_tile(M, ROW_TILE_CAP, 8)
    tn = _divisor_tile(N, LANE_TILE_CAP, 128)
    return pl.pallas_call(
        _ln_linear_kernel,
        out_shape=jax.ShapeDtypeStruct((M, N), jnp.bfloat16),
        grid_spec=pltpu.PrefetchScalarGridSpec(
            num_scalar_prefetch=0,
            grid=(M // tm, N // tn),
            in_specs=[
                pl.BlockSpec((tm, D), lambda i, j: (i, 0)),
                pl.BlockSpec((1, D), lambda i, j: (0, 0)),
                pl.BlockSpec((1, D), lambda i, j: (0, 0)),
                pl.BlockSpec((D, tn), lambda i, j: (0, j)),
                pl.BlockSpec((1, tn), lambda i, j: (0, j)),
            ],
            out_specs=pl.BlockSpec((tm, tn), lambda i, j: (i, j)),
            scratch_shapes=[pltpu.VMEM((tm, D), jnp.bfloat16)],
        ),
        compiler_params=_cparams(("parallel", "arbitrary")),
    )(x, gamma.reshape(1, D), beta.reshape(1, D), w, b.reshape(1, N))


# ----------------------------------------------------------------------------
# Linear with fused residual add (attention output projection)
# ----------------------------------------------------------------------------

def _linear_residual_kernel(x_ref, w_ref, b_ref, r_ref, o_ref):
    o_ref[...] = (jnp.dot(x_ref[...], w_ref[...],
                          preferred_element_type=jnp.float32)
                  + b_ref[...]
                  + r_ref[...].astype(jnp.float32)).astype(o_ref.dtype)


def linear_residual(x, w, b, residual):
    M, D = x.shape
    _, N = w.shape
    tm = _divisor_tile(M, ROW_TILE_CAP, 8)
    tn = _divisor_tile(N, LANE_TILE_CAP, 128)
    return pl.pallas_call(
        _linear_residual_kernel,
        out_shape=jax.ShapeDtypeStruct((M, N), jnp.bfloat16),
        grid_spec=pltpu.PrefetchScalarGridSpec(
            num_scalar_prefetch=0,
            grid=(M // tm, N // tn),
            in_specs=[
                pl.BlockSpec((tm, D), lambda i, j: (i, 0)),
                pl.BlockSpec((D, tn), lambda i, j: (0, j)),
                pl.BlockSpec((1, tn), lambda i, j: (0, j)),
                pl.BlockSpec((tm, tn), lambda i, j: (i, j)),
            ],
            out_specs=pl.BlockSpec((tm, tn), lambda i, j: (i, j)),
        ),
        compiler_params=_cparams(("parallel", "parallel")),
    )(x, w, b.reshape(1, N), residual)


# ----------------------------------------------------------------------------
# Fused LayerNorm -> MLP (dense, gelu_new, dense) -> residual add
# FFN dim is tiled and accumulated in an f32 scratch.
# ----------------------------------------------------------------------------

def _ln_mlp_residual_kernel(x_ref, g_ref, bln_ref, w1_ref, b1_ref, w2_ref,
                            b2_ref, o_ref, hln_ref, acc_ref):
    f = pl.program_id(1)

    @pl.when(f == 0)
    def _():
        xv = x_ref[...].astype(jnp.float32)
        mu = jnp.mean(xv, axis=-1, keepdims=True)
        xc = xv - mu
        var = jnp.mean(xc * xc, axis=-1, keepdims=True)
        inv = jax.lax.rsqrt(var + 1e-5)
        hln_ref[...] = (xc * inv * g_ref[...] + bln_ref[...]).astype(hln_ref.dtype)
        acc_ref[...] = jnp.zeros_like(acc_ref)

    h = (jnp.dot(hln_ref[...], w1_ref[...], preferred_element_type=jnp.float32)
         + b1_ref[...])
    # GPT-2 "gelu_new" (tanh approximation)
    h = 0.5 * h * (1.0 + jnp.tanh(0.7978845608028654 * (h + 0.044715 * h * h * h)))
    acc_ref[...] += jnp.dot(h.astype(w2_ref.dtype), w2_ref[...],
                            preferred_element_type=jnp.float32)

    @pl.when(f == pl.num_programs(1) - 1)
    def _():
        o_ref[...] = (acc_ref[...] + b2_ref[...]
                      + x_ref[...].astype(jnp.float32)).astype(o_ref.dtype)


def ln_mlp_residual(x, gamma, beta, w1, b1, w2, b2):
    M, D = x.shape
    _, F = w1.shape
    tm = _divisor_tile(M, ROW_TILE_CAP, 8)
    tf = _divisor_tile(F, FF_TILE_CAP, 128)
    return pl.pallas_call(
        _ln_mlp_residual_kernel,
        out_shape=jax.ShapeDtypeStruct((M, D), jnp.bfloat16),
        grid_spec=pltpu.PrefetchScalarGridSpec(
            num_scalar_prefetch=0,
            grid=(M // tm, F // tf),
            in_specs=[
                pl.BlockSpec((tm, D), lambda i, f: (i, 0)),
                pl.BlockSpec((1, D), lambda i, f: (0, 0)),
                pl.BlockSpec((1, D), lambda i, f: (0, 0)),
                pl.BlockSpec((D, tf), lambda i, f: (0, f)),
                pl.BlockSpec((1, tf), lambda i, f: (0, f)),
                pl.BlockSpec((tf, D), lambda i, f: (f, 0)),
                pl.BlockSpec((1, D), lambda i, f: (0, 0)),
            ],
            out_specs=pl.BlockSpec((tm, D), lambda i, f: (i, 0)),
            scratch_shapes=[pltpu.VMEM((tm, D), jnp.bfloat16),
                            pltpu.VMEM((tm, D), jnp.float32)],
        ),
        compiler_params=_cparams(("parallel", "arbitrary")),
    )(x, gamma.reshape(1, D), beta.reshape(1, D), w1, b1.reshape(1, F),
      w2, b2.reshape(1, D))


# ----------------------------------------------------------------------------
# Standalone tiled LayerNorm (final LN before the LM head)
# ----------------------------------------------------------------------------

def _layernorm_kernel(x_ref, g_ref, b_ref, o_ref):
    xv = x_ref[...].astype(jnp.float32)
    mu = jnp.mean(xv, axis=-1, keepdims=True)
    xc = xv - mu
    var = jnp.mean(xc * xc, axis=-1, keepdims=True)
    inv = jax.lax.rsqrt(var + 1e-5)
    o_ref[...] = (xc * inv * g_ref[...] + b_ref[...]).astype(o_ref.dtype)


def layernorm(x, gamma, beta):
    M, D = x.shape
    tm = _divisor_tile(M, ROW_TILE_CAP, 8)
    return pl.pallas_call(
        _layernorm_kernel,
        out_shape=jax.ShapeDtypeStruct((M, D), jnp.bfloat16),
        grid_spec=pltpu.PrefetchScalarGridSpec(
            num_scalar_prefetch=0,
            grid=(M // tm,),
            in_specs=[
                pl.BlockSpec((tm, D), lambda i: (i, 0)),
                pl.BlockSpec((1, D), lambda i: (0, 0)),
                pl.BlockSpec((1, D), lambda i: (0, 0)),
            ],
            out_specs=pl.BlockSpec((tm, D), lambda i: (i, 0)),
        ),
        compiler_params=_cparams(("parallel",)),
    )(x, gamma.reshape(1, D), beta.reshape(1, D))


# ----------------------------------------------------------------------------
# Flash-style attention: KV-tiled online softmax, causal mask from iota,
# key-padding from a thin (B,1,S) mask.
# ----------------------------------------------------------------------------

def _flash_attn_kernel(kp_ref, q_ref, k_ref, v_ref, o_ref,
                       m_sc, l_sc, acc_sc, *, scale, tq, tk):
    qi = pl.program_id(2)
    ki = pl.program_id(3)

    @pl.when(ki == 0)
    def _():
        m_sc[...] = jnp.full_like(m_sc, -1e30)
        l_sc[...] = jnp.zeros_like(l_sc)
        acc_sc[...] = jnp.zeros_like(acc_sc)

    q_start = qi * tq
    k_start = ki * tk

    # Skip KV tiles that are entirely in the causal future of this Q tile.
    @pl.when(k_start < q_start + tq)
    def _():
        q = q_ref[0, 0]                                     # (tq, Dh) bf16
        k = k_ref[0, 0]                                     # (tk, Dh) bf16
        v = v_ref[0, 0]                                     # (tk, Dh) bf16
        s = jax.lax.dot_general(q, k, (((1,), (1,)), ((), ())),
                                preferred_element_type=jnp.float32) * scale
        rows = q_start + jax.lax.broadcasted_iota(jnp.int32, (tq, tk), 0)
        cols = k_start + jax.lax.broadcasted_iota(jnp.int32, (tq, tk), 1)
        keep = (cols <= rows) & (kp_ref[0] > 0.5)           # causal & key-pad
        s = jnp.where(keep, s, -1e30)

        m_new = jnp.maximum(m_sc[...], jnp.max(s, axis=-1, keepdims=True))
        alpha = jnp.exp(m_sc[...] - m_new)
        p = jnp.exp(s - m_new)
        l_sc[...] = alpha * l_sc[...] + jnp.sum(p, axis=-1, keepdims=True)
        acc_sc[...] = alpha * acc_sc[...] + jnp.dot(
            p.astype(v.dtype), v, preferred_element_type=jnp.float32)
        m_sc[...] = m_new

    @pl.when(ki == pl.num_programs(3) - 1)
    def _():
        inv = pl.reciprocal(l_sc[...], approx=True)
        o_ref[0, 0] = (acc_sc[...] * inv).astype(o_ref.dtype)


def flash_attention(q, k, v, kpmask):
    """q,k,v: (B,H,S,Dh) bf16; kpmask: (B,1,S) f32 (1=valid key, 0=pad)."""
    B, H, S, Dh = q.shape
    scale = 1.0 / (Dh ** 0.5)
    tq = _divisor_tile(S, ATTN_Q_TILE, 8)
    tk = _divisor_tile(S, ATTN_KV_TILE, 128)
    kernel = functools.partial(_flash_attn_kernel, scale=scale, tq=tq, tk=tk)
    return pl.pallas_call(
        kernel,
        out_shape=jax.ShapeDtypeStruct((B, H, S, Dh), jnp.bfloat16),
        grid_spec=pltpu.PrefetchScalarGridSpec(
            num_scalar_prefetch=0,
            grid=(B, H, S // tq, S // tk),
            in_specs=[
                pl.BlockSpec((1, 1, tk), lambda b, h, qi, ki: (b, 0, ki)),
                pl.BlockSpec((1, 1, tq, Dh), lambda b, h, qi, ki: (b, h, qi, 0)),
                pl.BlockSpec((1, 1, tk, Dh), lambda b, h, qi, ki: (b, h, ki, 0)),
                pl.BlockSpec((1, 1, tk, Dh), lambda b, h, qi, ki: (b, h, ki, 0)),
            ],
            out_specs=pl.BlockSpec((1, 1, tq, Dh), lambda b, h, qi, ki: (b, h, qi, 0)),
            scratch_shapes=[pltpu.VMEM((tq, 1), jnp.float32),
                            pltpu.VMEM((tq, 1), jnp.float32),
                            pltpu.VMEM((tq, Dh), jnp.float32)],
        ),
        compiler_params=_cparams(("parallel", "parallel", "parallel", "arbitrary")),
    )(kpmask, q, k, v)


# ----------------------------------------------------------------------------
# Tied LM head: logits = x @ wte^T, contracting against stored (V, D) layout
# (no transposed copy of the embedding is materialized in HBM).
# ----------------------------------------------------------------------------

def _lm_head_kernel(x_ref, wte_ref, o_ref, acc_ref):
    @pl.when(pl.program_id(2) == 0)
    def _():
        acc_ref[...] = jnp.zeros_like(acc_ref)
    acc_ref[...] += jax.lax.dot_general(
        x_ref[...], wte_ref[...], (((1,), (1,)), ((), ())),
        preferred_element_type=jnp.float32)
    @pl.when(pl.program_id(2) == pl.num_programs(2) - 1)
    def _():
        o_ref[...] = acc_ref[...].astype(o_ref.dtype)


def lm_head(x, wte):
    """x:(M,D) bf16, wte:(V,D) bf16 -> logits (M,V) f32."""
    M, D = x.shape
    V, _ = wte.shape
    tm = _divisor_tile(M, ROW_TILE_CAP, 8)
    # NOTE: for a real GPT-2 vocab (50257), pad V to a multiple of 128 so it tiles.
    tn = _divisor_tile(V, LANE_TILE_CAP, 128)
    tk = _divisor_tile(D, K_TILE_CAP, 128)
    return pl.pallas_call(
        _lm_head_kernel,
        out_shape=jax.ShapeDtypeStruct((M, V), jnp.float32),
        grid_spec=pltpu.PrefetchScalarGridSpec(
            num_scalar_prefetch=0,
            grid=(M // tm, V // tn, D // tk),
            in_specs=[
                pl.BlockSpec((tm, tk), lambda i, j, kk: (i, kk)),
                pl.BlockSpec((tn, tk), lambda i, j, kk: (j, kk)),
            ],
            out_specs=pl.BlockSpec((tm, tn), lambda i, j, kk: (i, j)),
            scratch_shapes=[pltpu.VMEM((tm, tn), jnp.float32)],
        ),
        compiler_params=_cparams(("parallel", "parallel", "arbitrary")),
    )(x, wte)


# ----------------------------------------------------------------------------
# SonnetGPT forward (glue: embedding lookup, head split/merge)
# ----------------------------------------------------------------------------

def sonnet_gpt_forward(params, input_ids, attention_mask):
    B, S = input_ids.shape
    D = params["wte"].shape[1]
    H = params["num_heads"]
    Dh = D // H

    # token + positional embeddings (dropout is eval-mode identity)
    x = (jnp.take(params["wte"], input_ids, axis=0)
         + params["wpe"][None, :S, :]).astype(jnp.bfloat16)
    x = x.reshape(B * S, D)

    # thin key-padding mask (causal part is generated inside the attention kernel)
    kpmask = attention_mask.astype(jnp.float32).reshape(B, 1, S)

    for layer in params["layers"]:
        # --- self-attention sublayer: fused LN + QKV projection ---
        qkv = ln_linear(x, layer["ln1_g"], layer["ln1_b"],
                        layer["wqkv"], layer["bqkv"])          # (B*S, 3D) bf16
        qkv = qkv.reshape(B, S, 3, H, Dh)
        q = qkv[:, :, 0].transpose(0, 2, 1, 3)                  # (B,H,S,Dh)
        k = qkv[:, :, 1].transpose(0, 2, 1, 3)
        v = qkv[:, :, 2].transpose(0, 2, 1, 3)
        o = flash_attention(q, k, v, kpmask)                    # (B,H,S,Dh)
        o = o.transpose(0, 2, 1, 3).reshape(B * S, D)
        x = linear_residual(o, layer["wo"], layer["bo"], x)     # fused residual
        # --- MLP sublayer: fused LN + dense/gelu/dense + residual ---
        x = ln_mlp_residual(x, layer["ln2_g"], layer["ln2_b"],
                            layer["w1"], layer["b1"], layer["w2"], layer["b2"])

    x = layernorm(x, params["lnf_g"], params["lnf_b"])

    # sonnet_head: bias-free Linear tied to the word embedding (V, D)
    logits = lm_head(x, params["wte"])                          # (B*S, V) f32
    return logits.reshape(B, S, -1)


# ----------------------------------------------------------------------------
# Deterministic synthetic parameter init (shapes per the module's __init__).
# Weights bf16, biases / LN params f32; QKV weights pre-fused to (D, 3D).
# ----------------------------------------------------------------------------

def init_params(key, vocab, max_pos, d, num_layers, num_heads):
    ff = 4 * d
    keys = iter(jax.random.split(key, 4 + num_layers * 8))

    def nrm(shape, scale=0.02):
        return (scale * jax.random.normal(next(keys), shape,
                                          dtype=jnp.float32)).astype(jnp.bfloat16)

    params = {
        "num_heads": num_heads,
        "wte": nrm((vocab, d)),       # word embedding == tied sonnet_head weight
        "wpe": nrm((max_pos, d)),
        "lnf_g": jnp.ones((d,), jnp.float32),
        "lnf_b": jnp.zeros((d,), jnp.float32),
        "layers": [],
    }
    for _ in range(num_layers):
        params["layers"].append({
            "ln1_g": jnp.ones((d,), jnp.float32),
            "ln1_b": jnp.zeros((d,), jnp.float32),
            "wqkv": nrm((d, 3 * d)),                 # [Wq | Wk | Wv] fused once
            "bqkv": jnp.zeros((3 * d,), jnp.float32),
            "wo": nrm((d, d)), "bo": jnp.zeros((d,), jnp.float32),
            "ln2_g": jnp.ones((d,), jnp.float32),
            "ln2_b": jnp.zeros((d,), jnp.float32),
            "w1": nrm((d, ff)), "b1": jnp.zeros((ff,), jnp.float32),
            "w2": nrm((ff, d)), "b2": jnp.zeros((d,), jnp.float32),
        })
    return params


if __name__ == "__main__":
    # small shapes (chosen so the row / vocab / q / kv grids take >1 step):
    # batch=2, seq=256, hidden=128, heads=2, layers=2, vocab=1024
    B, S, D, H, L, V, MAXPOS = 2, 256, 128, 2, 2, 1024, 256

    key = jax.random.PRNGKey(0)
    k_param, k_ids = jax.random.split(key)

    params = init_params(k_param, vocab=V, max_pos=MAXPOS, d=D,
                         num_layers=L, num_heads=H)

    input_ids = jax.random.randint(k_ids, (B, S), 0, V, dtype=jnp.int32)
    attention_mask = jnp.ones((B, S), dtype=jnp.int32)
    attention_mask = attention_mask.at[1, -16:].set(0)   # padding in batch 1

    # TODO(synk): top-p sampling `generate()` loop (sort/cumsum/multinomial) is
    # host-side decoding logic, not part of the forward kernel.
    logits = sonnet_gpt_forward(params, input_ids, attention_mask)
    logits = jax.block_until_ready(logits)

    assert logits.shape == (B, S, V) and logits.dtype == jnp.float32
    assert bool(jnp.all(jnp.isfinite(logits)))
    print("KERNEL_OK")
</pallas_src>

<mosaic_0001>
module attributes {stable_mosaic.version = 11 : i64} {
  func.func @_ln_linear_kernel(%arg0: i32, %arg1: i32, %arg2: memref<256x128xbf16, #tpu.memory_space<vmem>>, %arg3: memref<1x128xf32, #tpu.memory_space<vmem>>, %arg4: memref<1x128xf32, #tpu.memory_space<vmem>>, %arg5: memref<128x384xbf16, #tpu.memory_space<vmem>>, %arg6: memref<1x384xf32, #tpu.memory_space<vmem>>, %arg7: memref<256x384xbf16, #tpu.memory_space<vmem>>, %arg8: memref<256x128xbf16, #tpu.memory_space<vmem>>) attributes {dimension_semantics = [#tpu.dimension_semantics<parallel>, #tpu.dimension_semantics<arbitrary>], iteration_bounds = array<i64: 2, 1>, scalar_prefetch = 0 : i64, scratch_operands = 1 : i64, tpu.core_type = #tpu.core_type<tc>, window_params = [{transform_indices = @transform_0, window_bounds = array<i64: 256, 128>}, {pipeline_mode = #tpu.pipeline_mode<synchronous>, transform_indices = @transform_1, window_bounds = array<i64: 1, 128>}, {pipeline_mode = #tpu.pipeline_mode<synchronous>, transform_indices = @transform_2, window_bounds = array<i64: 1, 128>}, {transform_indices = @transform_3, window_bounds = array<i64: 128, 384>}, {transform_indices = @transform_4, window_bounds = array<i64: 1, 384>}, {transform_indices = @transform_5, window_bounds = array<i64: 256, 384>}]} {
    %c0_i32 = arith.constant 0 : i32
    %0 = arith.cmpi eq, %arg1, %c0_i32 : i32
    %1 = arith.extui %0 : i1 to i32
    %c0_i32_0 = arith.constant 0 : i32
    %2 = arith.cmpi ne, %1, %c0_i32_0 : i32
    scf.if %2 {
      %c0_8 = arith.constant 0 : index
      %c0_9 = arith.constant 0 : index
      %11 = vector.load %arg2[%c0_8, %c0_9] : memref<256x128xbf16, #tpu.memory_space<vmem>>, vector<256x128xbf16>
      %12 = arith.extf %11 : vector<256x128xbf16> to vector<256x128xf32>
      %cst_10 = arith.constant dense<0.000000e+00> : vector<256xf32>
      %13 = vector.multi_reduction <add>, %12, %cst_10 [1] : vector<256x128xf32> to vector<256xf32>
      %14 = vector.shape_cast %13 : vector<256xf32> to vector<256x1xf32>
      %cst_11 = arith.constant 1.280000e+02 : f32
      %15 = vector.broadcast %cst_11 : f32 to vector<256x1xf32>
      %16 = arith.divf %14, %15 : vector<256x1xf32>
      %17 = vector.broadcast %16 : vector<256x1xf32> to vector<256x128xf32>
      %18 = arith.subf %12, %17 : vector<256x128xf32>
      %19 = arith.mulf %18, %18 : vector<256x128xf32>
      %cst_12 = arith.constant dense<0.000000e+00> : vector<256xf32>
      %20 = vector.multi_reduction <add>, %19, %cst_12 [1] : vector<256x128xf32> to vector<256xf32>
      %21 = vector.shape_cast %20 : vector<256xf32> to vector<256x1xf32>
      %cst_13 = arith.constant 1.280000e+02 : f32
      %22 = vector.broadcast %cst_13 : f32 to vector<256x1xf32>
      %23 = arith.divf %21, %22 : vector<256x1xf32>
      %cst_14 = arith.constant 9.99999974E-6 : f32
      %24 = vector.broadcast %cst_14 : f32 to vector<256x1xf32>
      %25 = arith.addf %23, %24 : vector<256x1xf32>
      %26 = math.rsqrt %25 : vector<256x1xf32>
      %27 = vector.broadcast %26 : vector<256x1xf32> to vector<256x128xf32>
      %28 = arith.mulf %18, %27 : vector<256x128xf32>
      %c0_15 = arith.constant 0 : index
      %c0_16 = arith.constant 0 : index
      %29 = vector.load %arg3[%c0_15, %c0_16] : memref<1x128xf32, #tpu.memory_space<vmem>>, vector<1x128xf32>
      %30 = vector.broadcast %29 : vector<1x128xf32> to vector<256x128xf32>
      %31 = arith.mulf %28, %30 : vector<256x128xf32>
      %c0_17 = arith.constant 0 : index
      %c0_18 = arith.constant 0 : index
      %32 = vector.load %arg4[%c0_17, %c0_18] : memref<1x128xf32, #tpu.memory_space<vmem>>, vector<1x128xf32>
      %33 = vector.broadcast %32 : vector<1x128xf32> to vector<256x128xf32>
      %34 = arith.addf %31, %33 : vector<256x128xf32>
      %35 = arith.truncf %34 : vector<256x128xf32> to vector<256x128xbf16>
      %c0_19 = arith.constant 0 : index
      %c0_20 = arith.constant 0 : index
      %36 = vector.load %arg8[%c0_19, %c0_20] : memref<256x128xbf16, #tpu.memory_space<vmem>>, vector<256x128xbf16>
      tpu.vector_store %arg8[%c0_19, %c0_20], %35 {strides = array<i32>} : memref<256x128xbf16, #tpu.memory_space<vmem>>, vector<256x128xbf16>,
    } else {
    }
    %c0 = arith.constant 0 : index
    %c0_1 = arith.constant 0 : index
    %3 = vector.load %arg8[%c0, %c0_1] : memref<256x128xbf16, #tpu.memory_space<vmem>>, vector<256x128xbf16>
    %c0_2 = arith.constant 0 : index
    %c0_3 = arith.constant 0 : index
    %4 = vector.load %arg5[%c0_2, %c0_3] : memref<128x384xbf16, #tpu.memory_space<vmem>>, vector<128x384xbf16>
    %cst = arith.constant dense<0.000000e+00> : vector<256x384xf32>
    %5 = tpu.matmul %3, %4, %cst {dimension_numbers = #tpu.dot_dimension_numbers<[1], [0], [0], [1], [0, 0, 1, 1], [], []>} : vector<256x128xbf16>, vector<128x384xbf16>, vector<256x384xf32> -> vector<256x384xf32>
    %c0_4 = arith.constant 0 : index
    %c0_5 = arith.constant 0 : index
    %6 = vector.load %arg6[%c0_4, %c0_5] : memref<1x384xf32, #tpu.memory_space<vmem>>, vector<1x384xf32>
    %7 = vector.broadcast %6 : vector<1x384xf32> to vector<256x384xf32>
    %8 = arith.addf %5, %7 : vector<256x384xf32>
    %9 = arith.truncf %8 : vector<256x384xf32> to vector<256x384xbf16>
    %c0_6 = arith.constant 0 : index
    %c0_7 = arith.constant 0 : index
    %10 = vector.load %arg7[%c0_6, %c0_7] : memref<256x384xbf16, #tpu.memory_space<vmem>>, vector<256x384xbf16>
    tpu.vector_store %arg7[%c0_6, %c0_7], %9 {strides = array<i32>} : memref<256x384xbf16, #tpu.memory_space<vmem>>, vector<256x384xbf16>,
    return
  }
  func.func @transform_0(%arg0: i32, %arg1: i32) -> (i32, i32) {
    %c0_i32 = arith.constant 0 : i32
    %c0_i32_0 = arith.constant 0 : i32
    return %arg0, %c0_i32 : i32, i32
  }
  func.func @transform_1(%arg0: i32, %arg1: i32) -> (i32, i32) {
    %c0_i32 = arith.constant 0 : i32
    %c0_i32_0 = arith.constant 0 : i32
    %c0_i32_1 = arith.constant 0 : i32
    return %c0_i32, %c0_i32_0 : i32, i32
  }
  func.func @transform_2(%arg0: i32, %arg1: i32) -> (i32, i32) {
    %c0_i32 = arith.constant 0 : i32
    %c0_i32_0 = arith.constant 0 : i32
    %c0_i32_1 = arith.constant 0 : i32
    return %c0_i32, %c0_i32_0 : i32, i32
  }
  func.func @transform_3(%arg0: i32, %arg1: i32) -> (i32, i32) {
    %c0_i32 = arith.constant 0 : i32
    %c0_i32_0 = arith.constant 0 : i32
    return %c0_i32, %arg1 : i32, i32
  }
  func.func @transform_4(%arg0: i32, %arg1: i32) -> (i32, i32) {
    %c0_i32 = arith.constant 0 : i32
    %c0_i32_0 = arith.constant 0 : i32
    return %c0_i32, %arg1 : i32, i32
  }
  func.func @transform_5(%arg0: i32, %arg1: i32) -> (i32, i32) {
    %c0_i32 = arith.constant 0 : i32
    return %arg0, %arg1 : i32, i32
  }
}

</mosaic_0001>

<bundles_post_ra>
// kernel: tpu_custom_call.1
= control target key start
LH: loop header
LB: loop body
LE: loop exit
PB: predicated region body
PF: predicated region fallthrough
CT: control target
= control target key end

     0   :  { %s4082_s0 = inlined_call_operand.hbm [shape: bf16[512,128], index: 0, kind: input, shape index: {}]   ;;  %s4083_s1 = inlined_call_operand.hbm [shape: f32[1,128], index: 1, kind: input, shape index: {}]   ;;  %s4084_s2 = inlined_call_operand.hbm [shape: f32[1,128], index: 2, kind: input, shape index: {}]   ;;  %s4085_s3 = inlined_call_operand.hbm [shape: bf16[128,384], index: 3, kind: input, shape index: {}]   ;;  %s4086_s4 = inlined_call_operand.vmem [shape: f32[1,384], index: 4, kind: input, shape index: {}]   ;;  %s4087_s5 = inlined_call_operand.hbm [shape: bf16[512,384], index: 5, kind: output, shape index: {}]  }
   0x1   :  { %4092 = sst [smem:[#allocation16_spill]] %s4083_s1 }
   0x2   :  { %4093 = sst [smem:[#allocation17_spill]] %s4084_s2 }
   0x3   :  { %4094 = sst [smem:[#allocation18_spill]] %s4085_s3 }
   0x4   :  { %10 = vsyncpa [#allocation4], 0 }
   0x5   :  { %12 = vsyncpa [#allocation4 + $0x1], 0 }
   0x6   :  { %13 = vsyncpa [#allocation7], 0 }
   0x7   :  { %14 = vsyncpa [#allocation10], 0 }
   0x8   :  { %15 = vsyncpa [#allocation5], 0 }
   0x9   :  { %17 = vsyncpa [#allocation5 + $0x1], 0  ;;  %s2868_s18 = smov 0   ;;  %s2870_s19 = smov 0  }
   0xa   :  { %s2872_s20 = smov 0   ;;  %s2874_s21 = smov 0  }
   0xb   :  { %s2876_s22 = smov 0   ;;  %s2878_s23 = smov 0  }
   0xc LB: > { %s2024_s24 = sadd.s32 4294967295, %s2826_s23   ;;  %s2025_s25 = sadd.s32 4294967294, %s2826_s23   ;;  %s2826_s23 = sphi %s2878_s23, %s23_s23   ;;  %s2822_s22 = sphi %s2876_s22, %s4138_s22   ;;  %s2818_s21 = sphi %s2874_s21, %s4137_s21   ;;  %s2814_s20 = sphi %s2872_s20, %s4136_s20   ;;  %s2810_s19 = sphi %s2870_s19, %s4135_s19   ;;  %s2806_s18 = sphi %s2868_s18, %s4134_s18  }
   0xd   : > { %p55_p0 = scmp.ne.s32.totalorder %s2810_s19, %s2806_s18  ;;  %p2902_p1 = scmp.eq.s32.totalorder %s2024_s24, 0 }
   0xe   : > { %p2906_p2 = scmp.eq.s32.totalorder %s2024_s24, 1  ;;  %p181_p3 = scmp.eq.s32.totalorder %s2025_s25, 1 }
   0xf   : > { %p2912_p4 = por %p2902_p1, %p55_p0  ;;  %p2026_p5 = scmp.ge.s32.totalorder %s2826_s23, 1 }
  0x10   : > { %p2917_p6 = por %p181_p3, %p55_p0  ;;  %p188_p7 = scmp.lt.s32.totalorder %s2826_s23, 3 }
  0x11   : > { %s4099_s1 = sld [smem:[#allocation16_spill]]  ;;  %p2031_p9 = scmp.ge.s32.totalorder %s2826_s23, 2 }
  0x12   : > { %p2925_p8 = pnand %p2026_p5, %p188_p7  ;;  %s2828_s9 = smov [#allocation6]  }
  0x13   : > { %s202_s10 = sshll.u32 %s2828_s9, 4  ;;  %s4101_s2 = sld [smem:[#allocation17_spill]]  ;;  %s203_s10 = int_to_ptr.vmem [resolvable:$true] %s202_s10 }
  0x14   : > { %p2462_p10 = pneg %p2925_p8  ;;  %s4103_s3 = sld [smem:[#allocation18_spill]] }
  0x15   : > { %s2829_s24 = smov [#allocation8]   ;;  %s2830_s30 = smov [#allocation9]  }
  0x16   : > { %p2937_p11 = pnand %p2462_p10, %p2902_p1  ;;  %s214_s25 = sshll.u32 %s2829_s24, 4  ;;  %s215_s25 = int_to_ptr.vmem [resolvable:$true] %s214_s25 }
  0x17   : > { %s200_s7 = sshll.u32 %s4099_s1, 4  ;;  %s228_s6 = sshll.u32 %s2830_s30, 4  ;;  %s201_s7 = int_to_ptr.hbm [resolvable:$true] %s200_s7  ;;  %s229_s6 = int_to_ptr.vmem [resolvable:$true] %s228_s6 }
  0x18   : > { %2465 = dma.hbm_to_vmem [thread:$0]  (!%p2937_p11), %s201_s7, 16, %s203_s10, [#allocation7]  }
  0x19   : > { %s212_s13 = sshll.u32 %s4101_s2, 4  ;;  %s2831_s9 = smov 192   ;;  %s213_s13 = int_to_ptr.hbm [resolvable:$true] %s212_s13 }
  0x1a   : > { %s226_s17 = sshll.u32 %s4103_s3, 4  ;;  %s2832_s11 = smov 12   ;;  %s227_s17 = int_to_ptr.hbm [resolvable:$true] %s226_s17 }
  0x1b   : > { %2468 = dma.hbm_to_vmem [thread:$0]  (!%p2937_p11), %s213_s13, 16, %s215_s25, [#allocation7]  }
  0x1c   : > { %2471 = dma.hbm_to_vmem [thread:$0]  (!%p2937_p11), %s227_s17, 3072, %s229_s6, [#allocation10], %s2831_s9, %s2831_s9, %s2832_s11  }
  0x1d   : > { %s42_s12 = sadd.s32 1, %s2814_s20  ;;  %s35_s15 = sadd.s32 1, %s2822_s22 }
  0x1e   : > { %p49_p12 = scmp.ne.s32.totalorder %s2814_s20, %s2810_s19  ;;  %p37_p13 = scmp.ge.s32.totalorder %s35_s15, 2 }
  0x1f   : > { %p50_p0 = scmp.eq.s32.totalorder %s2826_s23, 0  ;;  %p2483_p5 = scmp.lt.s32.totalorder %s2826_s23, 2 }
  0x20   : > { %p2957_p3 = por %p2906_p2, %p49_p12  ;;  %s4140_s15 = smov (%p37_p13, %s35_s15), 0 }
  0x21   : > { %p2964_p7 = por %p50_p0, %p49_p12  ;;  %s250_s13 = sand.u32 1, %s2814_s20  }
  0x22   : > { %s39_s14 = ssub.s32 %s2822_s22, %s4140_s15  ;;  %s2032_s16 = sshll.u32 %s250_s13, 7 }
  0x23   : > { %p40_p10 = scmp.eq.s32.totalorder %s39_s14, 0  ;;  %s2205_s17 = sshll.u32 %s2822_s22, 7 }
  0x24   : > { %s259_s30 = scalar_lea.hbm %s4082_s0, %s2205_s17  ;;  %s254_s6 = scalar_lea.vmem [#allocation3], %s2032_s16 }
  0x25   : > { %s2973_s27 = scalar_select %p40_p10, %s2814_s20, %s42_s12  }
  0x26   : > { %s262_s9 = sshll.u32 %s254_s6, 4  ;;  %s260_s11 = sshll.u32 %s259_s30, 4  ;;  %s263_s9 = int_to_ptr.vmem [resolvable:$true] %s262_s9  ;;  %s261_s11 = int_to_ptr.hbm [resolvable:$true] %s260_s11 }
  0x27   : > { %p2473_p2 = pnand %p2483_p5, %p2964_p7  ;;  %s251_s1 = scalar_lea.sflag [#allocation4], %s250_s13 }
  0x28   : > { %s2833_s2 = smov 64   ;;  %s2834_s3 = smov 4  }
  0x29   : > { %2475 = dma.hbm_to_vmem [thread:$0]  (!%p2473_p2), %s261_s11, 2048, %s263_s9, %s251_s1, %s2833_s2, %s2833_s2, %s2834_s3  }
  0x2a   : > { %274 = sbr.rel (%p2925_p8) target bundleno = 906 (0x38a), region = 40  ;;  %s2985_s12 = sand.u32 (!%p2925_p8), 1, %s2810_s19  }
  0x2b   : > { %s2036_s14 = sshll.u32 (!%p2925_p8), %s2985_s12, 7  ;;  %s277_s16 = scalar_lea.sflag (!%p2925_p8), [#allocation4], %s2985_s12 }
  0x2c   : > { %s2989_s17 = scalar_lea.vmem (!%p2925_p8), [#allocation3], %s2036_s14 }
  0x2f   : > { %2789 = dma.done.wait (%p2912_p4), %s277_s16, 2048  }
  0x30   : > { %2791 = vsyncadd (%p2912_p4), %s277_s16, 4294965248 }
  0x31   : > { %2793 = dma.done.wait (%p2902_p1), [#allocation7], 32  }
  0x32   : > { %2795 = vsyncadd (%p2902_p1), [#allocation7], 4294967264 }
  0x33   : > { %2797 = dma.done.wait (%p2902_p1), [#allocation10], 3072  }
  0x34   : > { %2799 = vsyncadd (%p2902_p1), [#allocation10], 4294964224  ;;  %v3004_v0 = vld [vmem:[%s2989_s17 + $0x60] sm:$0xff]   ;;  %v3010_v2 = vld [vmem:[%s2989_s17 + $0x8] sm:$0xff]   ;;  %v2835_v21 = vmov 128.0   ;;  %s2444_s3 = smul.u32 384, %s2985_s12 }
  0x35   : > { %v3007_v1 = vld [vmem:[%s2989_s17] sm:$0xff]   ;;  %v2296_v3 = vunpack.c.l.bf16 %v3004_v0  ;;  %v2252_v5 = vunpack.c.l.bf16 %v3010_v2  ;;  %v2297_v6 = vunpack.c.h.bf16 %v3004_v0  ;;  %v2253_v8 = vunpack.c.h.bf16 %v3010_v2  ;;  %v3019_v9 = vld [vmem:[%s2989_s17 + $0x68] sm:$0xff]   ;;  %v3024_v10 = vld [vmem:[%s2989_s17 + $0x10] sm:$0xff]   ;;  %s2445_s28 = smul.u32 384, %s2818_s21  ;;  %s1879_s25 = scalar_lea.sflag [#allocation5], %s2985_s12 }
  0x36   : > { %v2248_v4 = vunpack.c.l.bf16 %v3007_v1  ;;  %v2249_v7 = vunpack.c.h.bf16 %v3007_v1  ;;  %v2301_v11 = vunpack.c.h.bf16 %v3019_v9  ;;  %v2300_v12 = vunpack.c.l.bf16 %v3019_v9  ;;  %v3034_v14 = vld [vmem:[%s2989_s17 + $0x70] sm:$0xff]   ;;  %v3046_v18 = vld [vmem:[%s2989_s17 + $0x18] sm:$0xff]   ;;  %s3706_s26 = scalar_lea.vmem [#allocation11], %s2444_s3  ;;  %s2756_s14 = scalar_lea.hbm %s4087_s5, 768 }
  0x37   : > { %452 = vadd.xlane.f32.xlu1 %v2296_v3  ;;  %408 = vadd.xlane.f32.xlu2 %v2252_v5  ;;  %v2256_v13 = vunpack.c.l.bf16 %v3024_v10  ;;  %v2304_v15 = vunpack.c.l.bf16 %v3034_v14  ;;  %v2257_v16 = vunpack.c.h.bf16 %v3024_v10  ;;  %v2305_v17 = vunpack.c.h.bf16 %v3034_v14  ;;  %v3082_v50 = vld [vmem:[%s2989_s17 + $0x78] sm:$0xff]   ;;  %v3154_v10 = vld [vmem:[%s2989_s17 + $0x28] sm:$0xff]   ;;  %s1893_s13 = scalar_lea.hbm %s4087_s5, %s2445_s28  ;;  %s1894_s21 = sshll.u32 %s3706_s26, 4  ;;  %s1895_s21 = int_to_ptr.vmem [resolvable:$true] %s1894_s21 }
  0x38   : > { %404 = vadd.xlane.f32.xlu0 %v2248_v4  ;;  %v2260_v19 = vunpack.c.l.bf16 %v3046_v18  ;;  %v2261_v20 = vunpack.c.h.bf16 %v3046_v18  ;;  %2548 = vrcp.f32 %v2835_v21  ;;  %v2308_v56 = vunpack.c.l.bf16 %v3082_v50  ;;  %s1896_s24 = sshll.u32 %s1893_s13, 4  ;;  %s1897_s24 = int_to_ptr.hbm [resolvable:$true] %s1896_s24 }
  0x39   : > { %v2309_v58 = vunpack.c.h.bf16 %v3082_v50  ;;  %s2750_s30 = sshra.s32 %s1897_s24, 4  ;;  %s2751_s30 = int_to_ptr.hbm [resolvable:$true] %s2750_s30 }
  0x3a   : > { %s2752_s6 = scalar_lea.hbm %s2751_s30, 384  ;;  %p2757_p11 = scmp.lt.s32.totalorder %s2751_s30, %s4087_s5 }
  0x3b   : > { %p2753_p1 = scmp.ne.s32.totalorder %s2751_s30, %s2752_s6  ;;  %p2758_p12 = scmp.lt.s32.totalorder %s2756_s14, %s2752_s6 }
  0x3d   : > { %p2754_p4 = pnand %p2753_p1, %p2957_p3  ;;  %p2759_p13 = por %p2758_p12, %p2757_p11 }
  0x3e   : > { %v2549_v22 = vpop.eup %2548 }
  0x3f   : > { %454 = vadd.xlane.f32.xlu1 %v2297_v6  ;;  %410 = vadd.xlane.f32.xlu2 %v2253_v8  ;;  %v469_v23 = vmul.f32 128.0, %v2549_v22  ;;  %vm473_vm0 = vweird.f32 %v2549_v22  ;;  %p2755_p8 = pneg %p2754_p4 }
  0x40   : > { %406 = vadd.xlane.f32.xlu0 %v2249_v7 }
  0x41   : > { %v470_v24 = vsub.f32 1.0, %v469_v23  ;;  %p2760_p0 = pnand %p2759_p13, %p2755_p8 }
  0x43   : > { %v471_v25 = vmul.f32 %v2549_v22, %v470_v24 }
  0x45   : > { %v472_v26 = vadd.f32 %v2549_v22, %v471_v25 }
  0x47   : > { %458 = vadd.xlane.f32.xlu1 %v2301_v11  ;;  %412 = vadd.xlane.f32.xlu2 %v2256_v13  ;;  %v3054_v27 = vsel %vm473_vm0, %v2549_v22, %v472_v26 }
  0x48   : > { %456 = vadd.xlane.f32.xlu0 %v2300_v12 }
  0x4f   : > { %460 = vadd.xlane.f32.xlu1 %v2304_v15  ;;  %462 = vadd.xlane.f32.xlu2 %v2305_v17 }
  0x50   : > { %414 = vadd.xlane.f32.xlu0 %v2257_v16 }
  0x57   : > { %416 = vadd.xlane.f32.xlu1 %v2260_v19  ;;  %418 = vadd.xlane.f32.xlu2 %v2261_v20 }
  0xaa   : > { %v453_v28 = vpop.xlane.xlu1 %452  ;;  %v409_v32 = vpop.xlane.xlu2 %408 }
  0xab   : > { %v405_v29 = vpop.xlane.xlu0 %404  ;;  %v499_v30 = vmul.f32 %v3054_v27, %v453_v28  ;;  %v477_v35 = vmul.f32 %v3054_v27, %v409_v32  ;;  %v3170_v32 = vld [vmem:[%s2989_s17 + $0x30] sm:$0xff]  }
  0xac   : > { %v475_v31 = vmul.f32 %v3054_v27, %v405_v29  ;;  %v4090_v29 = vunpack.c.h.bf16 %v3154_v10 }
  0xad   : > { %v3058_v33 = vsub.f32 %v2296_v3, %v499_v30  ;;  %v3067_v38 = vsub.f32 %v2252_v5, %v477_v35  ;;  %v4088_v35 = vunpack.c.l.bf16 %v3170_v32 }
  0xae   : > { %v3060_v34 = vsub.f32 %v2248_v4, %v475_v31 }
  0xaf   : > { %v563_v36 = vmul.f32 %v3058_v33, %v3058_v33  ;;  %v541_v46 = vmul.f32 %v3067_v38, %v3067_v38 }
  0xb0   : > { %v539_v37 = vmul.f32 %v3060_v34, %v3060_v34 }
  0xb1   : > { %619 = vadd.xlane.f32.xlu2 %v563_v36  ;;  %v2190_v36 = vld [vmem:[#allocation9 + $0xa8] sm:$0xf] }
  0xb2   : > { %571 = vadd.xlane.f32.xlu0 %v539_v37  ;;  %v455_v39 = vpop.xlane.xlu1 %454  ;;  %v411_v43 = vpop.xlane.xlu2 %410  ;;  %v2244_v37 = vld [vmem:[#allocation9 + $0xb0] sm:$0xf0] }
  0xb3   : > { %v407_v40 = vpop.xlane.xlu0 %406  ;;  %v500_v41 = vmul.f32 %v3054_v27, %v455_v39  ;;  %v478_v55 = vmul.f32 %v3054_v27, %v411_v43  ;;  %v2243_v39 = vld [vmem:[#allocation9 + $0xac] sm:$0xf]  ;;  %v2191_v18 = vor.u32 %v2244_v37, %v2190_v36 }
  0xb4   : > { %v476_v42 = vmul.f32 %v3054_v27, %v407_v40  ;;  %v2198_v40 = vld [vmem:[#allocation9 + $0xb0] sm:$0xf] }
  0xb5   : > { %v3071_v44 = vsub.f32 %v2297_v6, %v500_v41  ;;  %v3096_v61 = vsub.f32 %v2253_v8, %v478_v55  ;;  %v2245_v41 = vld [vmem:[#allocation9 + $0xb8] sm:$0xf0]  ;;  %1483 = vmatpush.bf16.msra.mxu0 %v2191_v18  ;;  %2420 = vmatpush.bf16.msra.mxu3 %v2191_v18 }
  0xb6   : > { %v3073_v45 = vsub.f32 %v2249_v7, %v476_v42  ;;  %v3122_v7 = vld [vmem:[%s2989_s17 + $0x20] sm:$0xff]   ;;  %v3177_v43 = vor.u32 %v2245_v41, %v2198_v40  ;;  %v2232_v40 = vld [vmem:[#allocation9 + $0x50] sm:$0xf0]  ;;  %v2231_v41 = vld [vmem:[#allocation9 + $0x4c] sm:$0xf] }
  0xb7   : > { %v564_v47 = vmul.f32 %v3071_v44, %v3071_v44  ;;  %v542_v3 = vmul.f32 %v3096_v61, %v3096_v61 }
  0xb8   : > { %v540_v48 = vmul.f32 %v3073_v45, %v3073_v45  ;;  %1661 = vmatpush.bf16.msra.mxu2 %v3177_v43 }
  0xb9   : > { %575 = vadd.xlane.f32.xlu2 %v541_v46  ;;  %v2178_v46 = vld [vmem:[#allocation9 + $0x90] sm:$0xf] }
  0xba   : > { %621 = vadd.xlane.f32.xlu0 %v564_v47  ;;  %573 = vadd.xlane.f32.xlu1 %v540_v48  ;;  %v459_v49 = vpop.xlane.xlu1 %458  ;;  %v413_v52 = vpop.xlane.xlu2 %412  ;;  %v2241_v47 = vld [vmem:[#allocation9 + $0x98] sm:$0xf0]  ;;  %v2240_v48 = vld [vmem:[#allocation9 + $0x94] sm:$0xf] }
  0xbb   : > { %v502_v51 = vmul.f32 %v3054_v27, %v459_v49  ;;  %v457_v53 = vpop.xlane.xlu0 %456  ;;  %v479_v57 = vmul.f32 %v3054_v27, %v413_v52  ;;  %v2179_v49 = vor.u32 %v2241_v47, %v2178_v46  ;;  %v2186_v52 = vld [vmem:[#allocation9 + $0x98] sm:$0xf] }
  0xbc   : > { %v501_v59 = vmul.f32 %v3054_v27, %v457_v53  ;;  %v2242_v53 = vld [vmem:[#allocation9 + $0xa0] sm:$0xf0]  ;;  %v2144_v46 = vld [vmem:[#allocation9 + $0x54] sm:$0xf0] }
  0xbd   : > { %v3085_v54 = vsub.f32 %v2301_v11, %v502_v51  ;;  %v3102_v62 = vsub.f32 %v2256_v13, %v479_v57  ;;  %v2180_v51 = vld [vmem:[#allocation9 + $0x9c] sm:$0xf0]  ;;  %v3183_v57 = vor.u32 %v2242_v53, %v2186_v52  ;;  %1484 = vmatpush.bf16.msra.mxu0 %v2179_v49  ;;  %2421 = vmatpush.bf16.msra.mxu3 %v2179_v49  ;;  %v2233_v49 = vld [vmem:[#allocation9 + $0x58] sm:$0xf0]  ;;  %v2130_v53 = vld [vmem:[#allocation9 + $0x30] sm:$0xf] }
  0xbe   : > { %v3108_v63 = vsub.f32 %v2300_v12, %v501_v59  ;;  %v4091_v12 = vunpack.c.l.bf16 %v3122_v7  ;;  %v3181_v55 = vor.u32 %v2240_v48, %v2180_v51  ;;  %v2166_v59 = vld [vmem:[#allocation9 + $0x78] sm:$0xf]  ;;  %v2150_v48 = vld [vmem:[#allocation9 + $0x50] sm:$0xf]  ;;  %v3207_v51 = vor.u32 %v2231_v41, %v2144_v46  ;;  %v2226_v46 = vld [vmem:[#allocation9 + $0x20] sm:$0xf0] }
  0xbf   : > { %v566_v60 = vmul.f32 %v3085_v54, %v3085_v54  ;;  %v543_v2 = vmul.f32 %v3102_v62, %v3102_v62  ;;  %1662 = vmatpush.bf16.msra.mxu2 %v3183_v57  ;;  %v3209_v52 = vor.u32 %v2233_v49, %v2150_v48  ;;  %v2120_v49 = vld [vmem:[#allocation9 + $0x24] sm:$0xf0] }
  0xc0   : > { %v565_v5 = vmul.f32 %v3108_v63, %v3108_v63 }
  0xc1   : > { %625 = vadd.xlane.f32.xlu2 %v566_v60  ;;  %v2238_v60 = vld [vmem:[#allocation9 + $0x80] sm:$0xf0] }
  0xc2   : > { %464 = vadd.xlane.f32.xlu0 %v2308_v56  ;;  %466 = vadd.xlane.f32.xlu1 %v2309_v58  ;;  %v461_v0 = vpop.xlane.xlu1 %460  ;;  %v463_v1 = vpop.xlane.xlu2 %462 }
  0xc3   : > { %v504_v4 = vmul.f32 %v3054_v27, %v463_v1  ;;  %v415_v9 = vpop.xlane.xlu0 %414  ;;  %v503_v22 = vmul.f32 %v3054_v27, %v461_v0  ;;  %v2237_v0 = vld [vmem:[#allocation9 + $0x7c] sm:$0xf]  ;;  %v2167_v1 = vor.u32 %v2238_v60, %v2166_v59  ;;  %v2228_v60 = vld [vmem:[#allocation9 + $0x34] sm:$0xf] }
  0xc4   : > { %v480_v21 = vmul.f32 %v3054_v27, %v415_v9  ;;  %v2154_v9 = vld [vmem:[#allocation9 + $0x60] sm:$0xf]  ;;  %v2229_v59 = vld [vmem:[#allocation9 + $0x38] sm:$0xf0] }
  0xc5   : > { %v3119_v6 = vsub.f32 %v2305_v17, %v504_v4  ;;  %v2265_v17 = vunpack.c.h.bf16 %v3122_v7  ;;  %v3143_v25 = vsub.f32 %v2304_v15, %v503_v22  ;;  %v4089_v15 = vunpack.c.l.bf16 %v3154_v10  ;;  %v2239_v4 = vld [vmem:[#allocation9 + $0x88] sm:$0xf0]  ;;  %1485 = vmatpush.bf16.msra.mxu0 %v2167_v1  ;;  %2422 = vmatpush.bf16.msra.mxu3 %v2167_v1 }
  0xc6   : > { %v3139_v24 = vsub.f32 %v2257_v16, %v480_v21 }
  0xc7   : > { %v568_v11 = vmul.f32 %v3119_v6, %v3119_v6 }
  0xc8   : > { %v544_v28 = vmul.f32 %v3139_v24, %v3139_v24 }
  0xc9   : > { %579 = vadd.xlane.f32.xlu2 %v543_v2  ;;  %v2168_v2 = vld [vmem:[#allocation9 + $0x84] sm:$0xf0] }
  0xca   : > { %577 = vadd.xlane.f32.xlu0 %v542_v3  ;;  %623 = vadd.xlane.f32.xlu1 %v565_v5  ;;  %v417_v8 = vpop.xlane.xlu1 %416  ;;  %v419_v14 = vpop.xlane.xlu2 %418  ;;  %v2174_v3 = vld [vmem:[#allocation9 + $0x80] sm:$0xf]  ;;  %v3187_v5 = vor.u32 %v2237_v0, %v2168_v2  ;;  %v2131_v2 = vor.u32 %v2229_v59, %v2130_v53 }
  0xcb   : > { %v481_v13 = vmul.f32 %v3054_v27, %v417_v8  ;;  %v482_v16 = vmul.f32 %v3054_v27, %v419_v14  ;;  %v3189_v8 = vor.u32 %v2239_v4, %v2174_v3  ;;  %v2236_v14 = vld [vmem:[#allocation9 + $0x70] sm:$0xf0]  ;;  %v2132_v3 = vld [vmem:[#allocation9 + $0x3c] sm:$0xf0]  ;;  %v2138_v4 = vld [vmem:[#allocation9 + $0x38] sm:$0xf] }
  0xcc   : > { %v2126_v53 = vld [vmem:[#allocation9 + $0x20] sm:$0xf] }
  0xcd   : > { %v3135_v23 = vsub.f32 %v2260_v19, %v481_v13  ;;  %v567_v19 = vmul.f32 %v3143_v25, %v3143_v25  ;;  %v3163_v30 = vsub.f32 %v2261_v20, %v482_v16  ;;  %v2192_v20 = vld [vmem:[#allocation9 + $0xb4] sm:$0xf0]  ;;  %1663 = vmatpush.bf16.msra.mxu2 %v3189_v8  ;;  %v2234_v13 = vld [vmem:[#allocation9 + $0x64] sm:$0xf] }
  0xce   : > { %v3175_v42 = vor.u32 %v2243_v39, %v2192_v20  ;;  %v2142_v20 = vld [vmem:[#allocation9 + $0x48] sm:$0xf] }
  0xcf   : > { %v545_v26 = vmul.f32 %v3135_v23, %v3135_v23  ;;  %v546_v31 = vmul.f32 %v3163_v30, %v3163_v30  ;;  %v2143_v47 = vor.u32 %v2232_v40, %v2142_v20 }
  0xd0   : > { %1572 = vmatpush.bf16.msra.mxu1 %v3175_v42 }
  0xd1   : > { %629 = vadd.xlane.f32.xlu2 %v568_v11  ;;  %v2235_v11 = vld [vmem:[#allocation9 + $0x68] sm:$0xf0] }
  0xd2   : > { %420 = vadd.xlane.f32.xlu0 %v4091_v12  ;;  %422 = vadd.xlane.f32.xlu1 %v2265_v17 }
  0xd4   : > { %1573 = vmatpush.bf16.msra.mxu1 %v3181_v55 }
  0xd8   : > { %1574 = vmatpush.bf16.msra.mxu1 %v3187_v5 }
  0xd9   : > { %583 = vadd.xlane.f32.xlu2 %v545_v26  ;;  %v2155_v26 = vor.u32 %v2235_v11, %v2154_v9  ;;  %v2230_v9 = vld [vmem:[#allocation9 + $0x40] sm:$0xf0] }
  0xda   : > { %581 = vadd.xlane.f32.xlu0 %v544_v28  ;;  %627 = vadd.xlane.f32.xlu1 %v567_v19  ;;  %v2156_v28 = vld [vmem:[#allocation9 + $0x6c] sm:$0xf0]  ;;  %v2162_v19 = vld [vmem:[#allocation9 + $0x68] sm:$0xf] }
  0xdb   : > { %v3195_v36 = vor.u32 %v2234_v13, %v2156_v28  ;;  %v3197_v37 = vor.u32 %v2236_v14, %v2162_v19  ;;  %1486 = vmatpush.bf16.msra.mxu0 %v2155_v26  ;;  %2423 = vmatpush.bf16.msra.mxu3 %v2155_v26  ;;  %v3217_v26 = vor.u32 %v2230_v9, %v2138_v4  ;;  %v2223_v4 = vld [vmem:[#allocation9 + $0x8] sm:$0xf0]  ;;  %v2222_v9 = vld [vmem:[#allocation9 + $0x4] sm:$0xf] }
  0xdd   : > { %1575 = vmatpush.bf16.msra.mxu1 %v3195_v36  ;;  %1664 = vmatpush.bf16.msra.mxu2 %v3197_v37 }
  0xdf   : > { %1487 = vmatpush.bf16.msra.mxu0 %v2143_v47  ;;  %2424 = vmatpush.bf16.msra.mxu3 %v2143_v47  ;;  %v2225_v47 = vld [vmem:[#allocation9 + $0x1c] sm:$0xf] }
  0xe1   : > { %1576 = vmatpush.bf16.msra.mxu1 %v3207_v51  ;;  %1665 = vmatpush.bf16.msra.mxu2 %v3209_v52 }
  0xe2   : > { %424 = vadd.xlane.f32.xlu0 %v4089_v15  ;;  %426 = vadd.xlane.f32.xlu1 %v4090_v29 }
  0xe3   : > { %1488 = vmatpush.bf16.msra.mxu0 %v2131_v2  ;;  %2425 = vmatpush.bf16.msra.mxu3 %v2131_v2  ;;  %v3241_v2 = vor.u32 %v2225_v47, %v2120_v49  ;;  %v2224_v47 = vld [vmem:[#allocation9 + $0x10] sm:$0xf0] }
  0xe5   : > { %1666 = vmatpush.bf16.msra.mxu2 %v3217_v26 }
  0xea   : > { %585 = vadd.xlane.f32.xlu0 %v546_v31 }
  0xf2   : > { %428 = vadd.xlane.f32.xlu0 %v4088_v35  ;;  %v2114_v35 = vld [vmem:[#allocation9 + $0x8] sm:$0xf] }
 0x124   : > { %v620_v21 = vpop.xlane.xlu2 %619 }
 0x125   : > { %v572_v22 = vpop.xlane.xlu0 %571  ;;  %v659_v16 = vmul.f32 %v620_v21, %v3054_v27 }
 0x126   : > { %v635_v31 = vmul.f32 %v572_v22, %v3054_v27  ;;  %v3215_v22 = vor.u32 %v2228_v60, %v2132_v3  ;;  %v2227_v60 = vld [vmem:[#allocation9 + $0x28] sm:$0xf0]  ;;  %v2106_v3 = vld [vmem:[#allocation9] sm:$0xf] }
 0x127   : > { %v3199_v39 = vadd.f32 1e-05, %v659_v16 }
 0x128   : > { %v3201_v18 = vadd.f32 1e-05, %v635_v31  ;;  %v2118_v31 = vld [vmem:[#allocation9 + $0x18] sm:$0xf]  ;;  %1577 = vmatpush.bf16.msra.mxu1 %v3215_v22 }
 0x129   : > { %2550 = vrsqrt.f32 %v3199_v39  ;;  %vm945_vm2 = vweird.f32 %v3199_v39 }
 0x12a   : > { %2552 = vrsqrt.f32 %v3201_v18  ;;  %vm705_vm4 = vweird.f32 %v3201_v18 }
 0x12c   : > { %v576_v0 = vpop.xlane.xlu2 %575  ;;  %1578 = vmatpush.bf16.msra.mxu1 %v3241_v2 }
 0x12d   : > { %v622_v1 = vpop.xlane.xlu0 %621  ;;  %v637_v11 = vmul.f32 %v576_v0, %v3054_v27  ;;  %v574_v13 = vpop.xlane.xlu1 %573 }
 0x12e   : > { %v660_v21 = vmul.f32 %v622_v1, %v3054_v27  ;;  %v636_v28 = vmul.f32 %v574_v13, %v3054_v27  ;;  %v2119_v1 = vor.u32 %v2226_v46, %v2118_v31  ;;  %v2107_v46 = vor.u32 %v2223_v4, %v2106_v3 }
 0x12f   : > { %v3220_v19 = vpop.eup %2550  ;;  %v3222_v14 = vadd.f32 1e-05, %v637_v11 }
 0x130   : > { %v3224_v16 = vadd.f32 1e-05, %v660_v21  ;;  %v3226_v20 = vpop.eup %2552  ;;  %v940_v40 = vmul.f32 %v3220_v19, %v3199_v39  ;;  %v3230_v41 = vadd.f32 1e-05, %v636_v28  ;;  %vm946_vm1 = vweird.f32 %v3220_v19  ;;  %1489 = vmatpush.bf16.msra.mxu0 %v2119_v1  ;;  %2426 = vmatpush.bf16.msra.mxu3 %v2119_v1 }
 0x131   : > { %v700_v48 = vmul.f32 %v3226_v20, %v3201_v18  ;;  %2554 = vrsqrt.f32 %v3222_v14  ;;  %v3244_v28 = vor.u32 %v2227_v60, %v2126_v53  ;;  %v3253_v60 = vor.u32 %v2224_v47, %v2114_v35  ;;  %vm3275_vm5 = vmor %vm945_vm2, %vm946_vm1 }
 0x132   : > { %v941_v59 = vmul.f32 %v3220_v19, %v940_v40  ;;  %2556 = vrsqrt.f32 %v3230_v41  ;;  %v2108_v40 = vld [vmem:[#allocation9 + $0xc] sm:$0xf0]  ;;  %vm706_vm3 = vweird.f32 %v3226_v20  ;;  %vm715_vm7 = vweird.f32 %v3230_v41 }
 0x133   : > { %v701_v0 = vmul.f32 %v3226_v20, %v700_v48  ;;  %2558 = vrsqrt.f32 %v3224_v16  ;;  %1667 = vmatpush.bf16.msra.mxu2 %v3244_v28  ;;  %v3251_v53 = vor.u32 %v2222_v9, %v2108_v40  ;;  %vm3289_vm6 = vmor %vm705_vm4, %vm706_vm3  ;;  %vm725_vm10 = vweird.f32 %v3222_v14 }
 0x134   : > { %v942_v11 = vmul.f32 0.5, %v941_v59  ;;  %v626_v13 = vpop.xlane.xlu2 %625  ;;  %1490 = vmatpush.bf16.msra.mxu0 %v2107_v46  ;;  %2427 = vmatpush.bf16.msra.mxu3 %v2107_v46  ;;  %vm955_vm11 = vweird.f32 %v3224_v16 }
 0x135   : > { %v465_v21 = vpop.xlane.xlu0 %464  ;;  %v702_v15 = vmul.f32 0.5, %v701_v0  ;;  %v662_v48 = vmul.f32 %v626_v13, %v3054_v27  ;;  %v467_v29 = vpop.xlane.xlu1 %466  ;;  %1579 = vmatpush.bf16.msra.mxu1 %v3251_v53 }
 0x136   : > { %v505_v31 = vmul.f32 %v3054_v27, %v465_v21  ;;  %v943_v49 = vsub.f32 1.5, %v942_v11  ;;  %v506_v59 = vmul.f32 %v3054_v27, %v467_v29 }
 0x137   : > { %v3255_v0 = vpop.eup %2554  ;;  %v703_v13 = vsub.f32 1.5, %v702_v15  ;;  %v3259_v1 = vadd.f32 1e-05, %v662_v48  ;;  %1668 = vmatpush.bf16.msra.mxu2 %v3253_v60 }
 0x138   : > { %v3261_v3 = vpop.eup %2556  ;;  %v944_v29 = vmul.f32 %v3220_v19, %v943_v49  ;;  %v720_v4 = vmul.f32 %v3255_v0, %v3222_v14  ;;  %v3269_v35 = vsub.f32 %v2309_v58, %v506_v59  ;;  %v3285_v11 = vsub.f32 %v2308_v56, %v505_v31  ;;  %2428 = vmatpush.bf16.msrb.mxu3 %v3175_v42 }
 0x139   : > { %v3271_v9 = vpop.eup %2558  ;;  %v704_v39 = vmul.f32 %v3226_v20, %v703_v13  ;;  %v710_v18 = vmul.f32 %v3261_v3, %v3230_v41  ;;  %2560 = vrsqrt.f32 %v3259_v1  ;;  %vm716_vm8 = vweird.f32 %v3261_v3 }
 0x13a   : > { %v950_v21 = vmul.f32 %v3271_v9, %v3224_v16  ;;  %v948_v50 = vsel %vm3275_vm5, %v3220_v19, %v944_v29  ;;  %v721_v40 = vmul.f32 %v3255_v0, %v720_v4  ;;  %v570_v46 = vmul.f32 %v3269_v35, %v3269_v35  ;;  %v3314_v29 = vld [vmem:[#allocation6] ss:$0 sm:$0xff]  ;;  %vm717_vm12 = vmor %vm715_vm7, %vm716_vm8 }
 0x13b   : > { %v708_v56 = vsel %vm3289_vm6, %v3226_v20, %v704_v39  ;;  %v711_v48 = vmul.f32 %v3261_v3, %v710_v18  ;;  %v569_v20 = vmul.f32 %v3285_v11, %v3285_v11  ;;  %v1043_v42 = vmul.f32 %v948_v50, %v3058_v33 }
 0x13c   : > { %v951_v31 = vmul.f32 %v3271_v9, %v950_v21  ;;  %v580_v47 = vpop.xlane.xlu2 %579  ;;  %v1019_v4 = vmul.f32 %v708_v56, %v3060_v34  ;;  %633 = vadd.xlane.f32.xlu2 %v570_v46  ;;  %v722_v58 = vmul.f32 0.5, %v721_v40  ;;  %2429 = vmatpush.bf16.msrb.mxu3 %v3181_v55  ;;  %vm956_vm9 = vweird.f32 %v3271_v9  ;;  %v3342_v46 = vld [vmem:[#allocation8] ss:$0 sm:$0xff] }
 0x13d   : > { %v578_v49 = vpop.xlane.xlu0 %577  ;;  %v712_v19 = vmul.f32 0.5, %v711_v48  ;;  %v639_v59 = vmul.f32 %v580_v47, %v3054_v27  ;;  %v624_v13 = vpop.xlane.xlu1 %623  ;;  %631 = vadd.xlane.f32.xlu1 %v569_v20  ;;  %v2273_v34 = vunpack.c.h.bf16 %v3170_v32  ;;  %v1079_v56 = vmul.f32 %v3314_v29, %v1043_v42  ;;  %vm957_vm13 = vmor %vm955_vm11, %vm956_vm9 }
 0x13e   : > { %v952_v15 = vmul.f32 0.5, %v951_v31  ;;  %v661_v39 = vmul.f32 %v624_v13, %v3054_v27  ;;  %v638_v47 = vmul.f32 %v578_v49, %v3054_v27  ;;  %v1055_v49 = vmul.f32 %v3314_v29, %v1019_v4 }
 0x13f   : > { %v3319_v18 = vpop.eup %2560  ;;  %v713_v21 = vsub.f32 1.5, %v712_v19  ;;  %v3321_v48 = vadd.f32 1e-05, %v639_v59  ;;  %v723_v16 = vsub.f32 1.5, %v722_v58  ;;  %vm975_vm14 = vweird.f32 %v3259_v1 }
 0x140   : > { %v953_v12 = vsub.f32 1.5, %v952_v15  ;;  %v970_v33 = vmul.f32 %v3319_v18, %v3259_v1  ;;  %v3340_v31 = vadd.f32 1e-05, %v661_v39  ;;  %v3348_v20 = vadd.f32 1e-05, %v638_v47  ;;  %2430 = vmatpush.bf16.msrb.mxu3 %v3187_v5 }
 0x141   : > { %v714_v50 = vmul.f32 %v3261_v3, %v713_v21  ;;  %2562 = vrsqrt.f32 %v3321_v48  ;;  %vm976_vm15 = vweird.f32 %v3319_v18  ;;  %vm726_vm0 = vweird.f32 %v3255_v0 }
 0x142   : > { %v954_v55 = vmul.f32 %v3271_v9, %v953_v12  ;;  %v971_v40 = vmul.f32 %v3319_v18, %v970_v33  ;;  %2564 = vrsqrt.f32 %v3340_v31  ;;  %v1115_v39 = vadd.f32 %v3342_v46, %v1079_v56  ;;  %vm3377_vm1 = vmor %vm975_vm14, %vm976_vm15 }
 0x143   : > { %v718_v19 = vsel %vm717_vm12, %v3261_v3, %v714_v50  ;;  %2566 = vrsqrt.f32 %v3348_v20  ;;  %v1091_v47 = vadd.f32 %v3342_v46, %v1055_v49  ;;  %v724_v33 = vmul.f32 %v3255_v0, %v723_v16  ;;  %vm3406_vm2 = vmor %vm725_vm10, %vm726_vm0 }
 0x144   : > { %v1020_v12 = vmul.f32 %v718_v19, %v3073_v45  ;;  %v958_v41 = vsel %vm957_vm13, %v3271_v9, %v954_v55  ;;  %v972_v59 = vmul.f32 0.5, %v971_v40  ;;  %v630_v13 = vpop.xlane.xlu2 %629  ;;  %v3382_v40 = vld [vmem:[%s2989_s17 + $0x38] sm:$0xff]   ;;  %2431 = vmatpush.bf16.msrb.mxu3 %v3195_v36  ;;  %vm965_vm3 = vweird.f32 %v3340_v31 }
 0x145   : > { %v421_v42 = vpop.xlane.xlu0 %420  ;;  %v1044_v4 = vmul.f32 %v958_v41, %v3071_v44  ;;  %v423_v3 = vpop.xlane.xlu1 %422  ;;  %v664_v9 = vmul.f32 %v630_v13, %v3054_v27  ;;  %430 = vadd.xlane.f32.xlu1 %v2273_v34  ;;  %vm745_vm7 = vweird.f32 %v3321_v48  ;;  %vm735_vm8 = vweird.f32 %v3348_v20 }
 0x146   : > { %v1056_v45 = vmul.f32 %v3314_v29, %v1020_v12  ;;  %v973_v5 = vsub.f32 1.5, %v972_v59  ;;  %v484_v58 = vmul.f32 %v3054_v27, %v423_v3  ;;  %v483_v21 = vmul.f32 %v3054_v27, %v421_v42 }
 0x147   : > { %v3361_v15 = vpop.eup %2562  ;;  %v1080_v44 = vmul.f32 %v3314_v29, %v1044_v4  ;;  %v3388_v19 = vadd.f32 1e-05, %v664_v9  ;;  %v4112_v59 = vunpack.c.l.bf16 %v3122_v7  ;;  %v2276_v3 = vunpack.c.l.bf16 %v3382_v40 }
 0x148   : > { %v1092_v50 = vadd.f32 %v3342_v46, %v1056_v45  ;;  %v974_v55 = vmul.f32 %v3319_v18, %v973_v5  ;;  %v740_v16 = vmul.f32 %v3361_v15, %v3321_v48  ;;  %v3392_v12 = vsub.f32 %v2265_v17, %v484_v58  ;;  %v3394_v1 = vpop.eup %2564  ;;  %2432 = vmatpush.bf16.msrb.mxu3 %v3207_v51 }
 0x149   : > { %v1116_v49 = vadd.f32 %v3342_v46, %v1080_v44  ;;  %v3398_v13 = vsub.f32 %v4112_v59, %v483_v21  ;;  %v3400_v42 = vpop.eup %2566  ;;  %v960_v7 = vmul.f32 %v3394_v1, %v3340_v31  ;;  %v728_v45 = vsel %vm3406_vm2, %v3255_v0, %v724_v33 }
 0x14a   : > { %v2313_v41 = vpack.c.bf16 %v1092_v50, %v1091_v47  ;;  %v978_v17 = vsel %vm3377_vm1, %v3319_v18, %v974_v55  ;;  %v730_v14 = vmul.f32 %v3400_v42, %v3348_v20  ;;  %2568 = vrsqrt.f32 %v3388_v19 }
 0x14b   : > { %v2373_v4 = vpack.c.bf16 %v1116_v49, %v1115_v39  ;;  %v741_v18 = vmul.f32 %v3361_v15, %v740_v16  ;;  %v961_v39 = vmul.f32 %v3394_v1, %v960_v7  ;;  %v548_v0 = vmul.f32 %v3392_v12, %v3392_v12 }
 0x14c   : > { %2314 = vst [vmem:[#allocation2 + $0x30] sm:$0xff] %v2313_v41   ;;  %v584_v5 = vpop.xlane.xlu2 %583  ;;  %v1046_v58 = vmul.f32 %v978_v17, %v3085_v54  ;;  %v731_v21 = vmul.f32 %v3400_v42, %v730_v14  ;;  %v547_v47 = vmul.f32 %v3398_v13, %v3398_v13  ;;  %vm966_vm4 = vweird.f32 %v3394_v1  ;;  %2433 = vmatpush.bf16.msrb.mxu3 %v3215_v22 }
 0x14d   : > { %v582_v9 = vpop.xlane.xlu0 %581  ;;  %2416 = vst [vmem:[#allocation2 + $0x60] sm:$0xff] %v2373_v4   ;;  %v628_v44 = vpop.xlane.xlu1 %627  ;;  %v641_v51 = vmul.f32 %v584_v5, %v3054_v27  ;;  %v962_v33 = vmul.f32 0.5, %v961_v39  ;;  %589 = vadd.xlane.f32.xlu0 %v548_v0  ;;  %432 = vadd.xlane.f32.xlu1 %v2276_v3  ;;  %v1021_v54 = vmul.f32 %v728_v45, %v3067_v38  ;;  %v742_v16 = vmul.f32 0.5, %v741_v18  ;;  %vm3452_vm5 = vmor %vm965_vm3, %vm966_vm4 }
 0x14e   : > { %v663_v50 = vmul.f32 %v628_v44, %v3054_v27  ;;  %v640_v55 = vmul.f32 %v582_v9, %v3054_v27  ;;  %v732_v56 = vmul.f32 0.5, %v731_v21  ;;  %587 = vadd.xlane.f32.xlu2 %v547_v47  ;;  %vm736_vm6 = vweird.f32 %v3400_v42 }
 0x14f   : > { %v3439_v49 = vadd.f32 1e-05, %v641_v51  ;;  %v963_v41 = vsub.f32 1.5, %v962_v33  ;;  %v2277_v22 = vunpack.c.h.bf16 %v3382_v40  ;;  %v1082_v7 = vmul.f32 %v3314_v29, %v1046_v58  ;;  %vm737_vm9 = vmor %vm735_vm8, %vm736_vm6 }
 0x150   : > { %v3442_v59 = vadd.f32 1e-05, %v663_v50  ;;  %v3444_v36 = vadd.f32 1e-05, %v640_v55  ;;  %v3446_v4 = vpop.eup %2568  ;;  %v733_v17 = vsub.f32 1.5, %v732_v56  ;;  %v1057_v5 = vmul.f32 %v3314_v29, %v1021_v54  ;;  %2434 = vmatpush.bf16.msrb.mxu3 %v3241_v2 }
 0x151   : > { %2570 = vrsqrt.f32 %v3439_v49  ;;  %v964_v45 = vmul.f32 %v3394_v1, %v963_v41  ;;  %v990_v31 = vmul.f32 %v3446_v4, %v3388_v19  ;;  %v743_v0 = vsub.f32 1.5, %v742_v16 }
 0x152   : > { %v734_v9 = vmul.f32 %v3400_v42, %v733_v17  ;;  %2572 = vrsqrt.f32 %v3442_v59  ;;  %vm746_vm10 = vweird.f32 %v3361_v15  ;;  %vm995_vm11 = vweird.f32 %v3388_v19  ;;  %v3506_v17 = vld [vmem:[%s2989_s17 + $0x40] sm:$0xff]  }
 0x153   : > { %v2206_v14 = vld [vmem:[#allocation2 + $0x30] sm:$0xff]  ;;  %v968_v44 = vsel %vm3452_vm5, %v3394_v1, %v964_v45  ;;  %v991_v58 = vmul.f32 %v3446_v4, %v990_v31  ;;  %2574 = vrsqrt.f32 %v3444_v36  ;;  %v1118_v1 = vadd.f32 %v3342_v46, %v1082_v7  ;;  %vm3520_vm13 = vmor %vm745_vm7, %vm746_vm10 }
 0x154   : > { %v3468_v39 = vld [vmem:[#allocation2 + $0x60] sm:$0xff]  ;;  %1491 = vmatmul.bf16.vlgmr.msra.gmra.mxu0 %v2206_v14  ;;  %1580 = vmatmul.bf16.vlgmr.msra.gmra.mxu1 %v2206_v14  ;;  %v1045_v21 = vmul.f32 %v968_v44, %v3108_v63  ;;  %v738_v47 = vsel %vm737_vm9, %v3400_v42, %v734_v9  ;;  %v4117_v42 = vunpack.c.h.bf16 %v3154_v10  ;;  %v4118_v56 = vunpack.c.l.bf16 %v3154_v10 }
 0x155   : > { %v425_v18 = vpop.xlane.xlu0 %424  ;;  %v427_v20 = vpop.xlane.xlu1 %426  ;;  %1551 = vmatmul.bf16.vlgmr.msra.gmra.mxu3 %v3468_v39  ;;  %v1022_v33 = vmul.f32 %v738_v47, %v3096_v61  ;;  %v992_v50 = vmul.f32 0.5, %v991_v58  ;;  %1669 = vmatmul.bf16.vlgmr.msra.gmra.mxu2 %v2206_v14  ;;  %vm996_vm12 = vweird.f32 %v3446_v4  ;;  %v744_v45 = vmul.f32 %v3361_v15, %v743_v0 }
 0x156   : > { %v486_v2 = vmul.f32 %v3054_v27, %v427_v20  ;;  %v485_v51 = vmul.f32 %v3054_v27, %v425_v18  ;;  %v1081_v63 = vmul.f32 %v3314_v29, %v1045_v21  ;;  %434 = vadd.xlane.f32.xlu2 %v2277_v22  ;;  %2435 = vmatpush.bf16.msrb.mxu3 %v3251_v53  ;;  %vm3531_vm14 = vmor %vm995_vm11, %vm996_vm12  ;;  %v2280_v21 = vunpack.c.l.bf16 %v3506_v17 }
 0x157   : > { %v3486_v55 = vpop.eup %2570  ;;  %v1058_v61 = vmul.f32 %v3314_v29, %v1022_v33  ;;  %v993_v41 = vsub.f32 1.5, %v992_v50  ;;  %v1093_v9 = vadd.f32 %v3342_v46, %v1057_v5  ;;  %v748_v19 = vsel %vm3520_vm13, %v3361_v15, %v744_v45 }
 0x158   : > { %v3494_v54 = vsub.f32 %v4117_v42, %v486_v2  ;;  %v3498_v16 = vsub.f32 %v4118_v56, %v485_v51  ;;  %v760_v38 = vmul.f32 %v3486_v55, %v3439_v49  ;;  %v2573_v7 = vpop.eup %2572  ;;  %v1117_v10 = vadd.f32 %v3342_v46, %v1081_v63 }
 0x159   : > { %v2575_v14 = vpop.eup %2574  ;;  %v1094_v18 = vadd.f32 %v3342_v46, %v1058_v61  ;;  %v994_v0 = vmul.f32 %v3446_v4, %v993_v41  ;;  %v980_v44 = vmul.f32 %v2573_v7, %v3442_v59  ;;  %vm985_vm15 = vweird.f32 %v3442_v59 }
 0x15a   : > { %2436 = vmatpush.bf16.msra.mxu3 %v3177_v43  ;;  %v550_v53 = vmul.f32 %v3494_v54, %v3494_v54  ;;  %v549_v31 = vmul.f32 %v3498_v16, %v3498_v16  ;;  %v2378_v58 = vpack.c.bf16 %v1118_v1, %v1117_v10  ;;  %v761_v48 = vmul.f32 %v3486_v55, %v760_v38  ;;  %v3572_v43 = vld [vmem:[%s2989_s17 + $0x48] sm:$0xff]  }
 0x15b   : > { %v750_v20 = vmul.f32 %v2575_v14, %v3444_v36  ;;  %v2318_v2 = vpack.c.bf16 %v1094_v18, %v1093_v9  ;;  %v981_v51 = vmul.f32 %v2573_v7, %v980_v44  ;;  %v2281_v1 = vunpack.c.h.bf16 %v3506_v17 }
 0x15c   : > { %593 = vadd.xlane.f32.xlu1 %v550_v53  ;;  %591 = vadd.xlane.f32.xlu0 %v549_v31  ;;  %2417 = vst [vmem:[#allocation2 + $0x70] sm:$0xff] %v2378_v58   ;;  %v998_v63 = vsel %vm3531_vm14, %v3446_v4, %v994_v0  ;;  %vm986_vm0 = vweird.f32 %v2573_v7  ;;  %vm755_vm1 = vweird.f32 %v3444_v36  ;;  %vm756_vm2 = vweird.f32 %v2575_v14 }
 0x15d   : > { %v586_v47 = vpop.xlane.xlu0 %585  ;;  %v751_v33 = vmul.f32 %v2575_v14, %v750_v20  ;;  %2405 = vst [vmem:[#allocation2] sm:$0xff] %v2318_v2   ;;  %v982_v42 = vmul.f32 0.5, %v981_v51  ;;  %v1048_v41 = vmul.f32 %v998_v63, %v3119_v6  ;;  %vm3555_vm3 = vmor %vm985_vm15, %vm986_vm0  ;;  %v1023_v38 = vmul.f32 %v748_v19, %v3102_v62 }
 0x15e   : > { %2437 = vmatpush.bf16.msra.mxu3 %v3183_v57  ;;  %v642_v50 = vmul.f32 %v586_v47, %v3054_v27  ;;  %v762_v57 = vmul.f32 0.5, %v761_v48  ;;  %436 = vadd.xlane.f32.xlu2 %v2280_v21  ;;  %vm3560_vm4 = vmor %vm755_vm1, %vm756_vm2  ;;  %vm765_vm5 = vweird.f32 %v3439_v49  ;;  %vm766_vm6 = vweird.f32 %v3486_v55 }
 0x15f   : > { %v752_v56 = vmul.f32 0.5, %v751_v33  ;;  %v983_v61 = vsub.f32 1.5, %v982_v42  ;;  %v1084_v62 = vmul.f32 %v3314_v29, %v1048_v41  ;;  %v4127_v5 = vunpack.c.l.bf16 %v3170_v32  ;;  %vm3600_vm7 = vmor %vm765_vm5, %vm766_vm6 }
 0x160   : > { %v674_v15 = vadd.f32 1e-05, %v642_v50  ;;  %v763_v53 = vsub.f32 1.5, %v762_v57  ;;  %v2285_v41 = vunpack.c.h.bf16 %v3572_v43 }
 0x161   : > { %v753_v36 = vsub.f32 1.5, %v752_v56  ;;  %v984_v45 = vmul.f32 %v2573_v7, %v983_v61  ;;  %v1120_v51 = vadd.f32 %v3342_v46, %v1084_v62 }
 0x162   : > { %2438 = vmatpush.bf16.msra.mxu3 %v3189_v8  ;;  %2576 = vrsqrt.f32 %v674_v15  ;;  %v764_v20 = vmul.f32 %v3486_v55, %v763_v53  ;;  %vm775_vm8 = vweird.f32 %v674_v15 }
 0x163   : > { %v754_v31 = vmul.f32 %v2575_v14, %v753_v36  ;;  %v988_v8 = vsel %vm3555_vm3, %v2573_v7, %v984_v45  ;;  %v3569_v9 = vld [vmem:[#allocation2 + $0x70] sm:$0xff]  ;;  %v1059_v7 = vmul.f32 %v3314_v29, %v1023_v38 }
 0x164   : > { %438 = vadd.xlane.f32.xlu0 %v2281_v1  ;;  %v1047_v18 = vmul.f32 %v988_v8, %v3143_v25  ;;  %v2207_v44 = vld [vmem:[#allocation2] sm:$0xff] }
 0x165   : > { %v429_v6 = vpop.xlane.xlu0 %428  ;;  %v758_v0 = vsel %vm3560_vm4, %v2575_v14, %v754_v31  ;;  %1556 = vmatmul.bf16.gmra.mxu3 %v3569_v9  ;;  %1496 = vmatmul.bf16.gmra.mxu0 %v2207_v44  ;;  %v2284_v14 = vunpack.c.l.bf16 %v3572_v43  ;;  %v1095_v50 = vadd.f32 %v3342_v46, %v1059_v7 }
 0x166   : > { %v487_v59 = vmul.f32 %v3054_v27, %v429_v6  ;;  %2439 = vmatpush.bf16.msra.mxu3 %v3197_v37  ;;  %v1024_v58 = vmul.f32 %v758_v0, %v3139_v24  ;;  %v1083_v25 = vmul.f32 %v3314_v29, %v1047_v18  ;;  %1585 = vmatmul.bf16.gmra.mxu1 %v2207_v44 }
 0x167   : > { %1674 = vmatmul.bf16.gmra.mxu2 %v2207_v44 }
 0x168   : > { %v3585_v48 = vsub.f32 %v4127_v5, %v487_v59  ;;  %v2577_v37 = vpop.eup %2576  ;;  %v1060_v47 = vmul.f32 %v3314_v29, %v1024_v58  ;;  %v1119_v33 = vadd.f32 %v3342_v46, %v1083_v25 }
 0x169   : > { %v770_v2 = vmul.f32 %v2577_v37, %v674_v15  ;;  %vm776_vm9 = vweird.f32 %v2577_v37 }
 0x16a   : > { %v551_v24 = vmul.f32 %v3585_v48, %v3585_v48  ;;  %2440 = vmatpush.bf16.msra.mxu3 %v3209_v52  ;;  %v1096_v63 = vadd.f32 %v3342_v46, %v1060_v47  ;;  %v2383_v57 = vpack.c.bf16 %v1120_v51, %v1119_v33  ;;  %v768_v52 = vsel %vm3600_vm7, %v3486_v55, %v764_v20  ;;  %vm777_vm10 = vmor %vm775_vm8, %vm776_vm9 }
 0x16b   : > { %v771_v42 = vmul.f32 %v2577_v37, %v770_v2  ;;  %v1025_v15 = vmul.f32 %v768_v52, %v3135_v23 }
 0x16c   : > { %595 = vadd.xlane.f32.xlu1 %v551_v24  ;;  %440 = vadd.xlane.f32.xlu0 %v2284_v14  ;;  %v2323_v49 = vpack.c.bf16 %v1096_v63, %v1095_v50  ;;  %2418 = vst [vmem:[#allocation2 + $0x78] sm:$0xff] %v2383_v57  }
 0x16d   : > { %v772_v56 = vmul.f32 0.5, %v771_v42  ;;  %v1061_v55 = vmul.f32 %v3314_v29, %v1025_v15 }
 0x16e   : > { %2441 = vmatpush.bf16.msra.mxu3 %v3217_v26  ;;  %2406 = vst [vmem:[#allocation2 + $0x58] sm:$0xff] %v2323_v49   ;;  %v3621_v26 = vld [vmem:[%s2989_s17 + $0x50] sm:$0xff]  }
 0x16f   : > { %v773_v61 = vsub.f32 1.5, %v772_v56  ;;  %v1097_v53 = vadd.f32 %v3342_v46, %v1061_v55 }
 0x171   : > { %v774_v4 = vmul.f32 %v2577_v37, %v773_v61 }
 0x172   : > { %2442 = vmatpush.bf16.msra.mxu3 %v3244_v28  ;;  %v2288_v28 = vunpack.c.l.bf16 %v3621_v26 }
 0x173   : > { %v778_v36 = vsel %vm777_vm10, %v2577_v37, %v774_v4  ;;  %v3623_v45 = vld [vmem:[#allocation2 + $0x78] sm:$0xff] }
 0x174   : > { %442 = vadd.xlane.f32.xlu1 %v2285_v41  ;;  %v1026_v38 = vmul.f32 %v778_v36, %v3163_v30 }
 0x175   : > { %v2208_v10 = vld [vmem:[#allocation2 + $0x58] sm:$0xff]  ;;  %1561 = vmatmul.bf16.gmra.mxu3 %v3623_v45 }
 0x176   : > { %2443 = vmatpush.bf16.msra.mxu3 %v3253_v60  ;;  %v1062_v23 = vmul.f32 %v3314_v29, %v1026_v38  ;;  %1501 = vmatmul.bf16.gmra.mxu0 %v2208_v10 }
 0x177   : > { %1590 = vmatmul.bf16.gmra.mxu1 %v2208_v10  ;;  %1679 = vmatmul.bf16.gmra.mxu2 %v2208_v10 }
 0x178   : > { %v1098_v31 = vadd.f32 %v3342_v46, %v1062_v23 }
 0x17a   : > { %v2328_v30 = vpack.c.bf16 %v1098_v31, %v1097_v53 }
 0x17c   : > { %444 = vadd.xlane.f32.xlu1 %v2288_v28  ;;  %2407 = vst [vmem:[#allocation2 + $0x18] sm:$0xff] %v2328_v30  }
 0x183   : > { %v2209_v60 = vld [vmem:[#allocation2 + $0x18] sm:$0xff] }
 0x186   : > { %1506 = vmatmul.bf16.gmra.mxu0 %v2209_v60 }
 0x187   : > { %1595 = vmatmul.bf16.gmra.mxu1 %v2209_v60  ;;  %1684 = vmatmul.bf16.gmra.mxu2 %v2209_v60 }
 0x1af   : > { %v634_v6 = vpop.xlane.xlu2 %633 }
 0x1b0   : > { %v666_v8 = vmul.f32 %v634_v6, %v3054_v27  ;;  %v632_v59 = vpop.xlane.xlu1 %631  ;;  %v1251_v6 = vld [vmem:[%s4086_s4] sm:$0x7] }
 0x1b1   : > { %v665_v62 = vmul.f32 %v632_v59, %v3054_v27 }
 0x1b2   : > { %v698_v18 = vadd.f32 1e-05, %v666_v8 }
 0x1b3   : > { %v697_v0 = vadd.f32 1e-05, %v665_v62 }
 0x1b4   : > { %2578 = vrsqrt.f32 %v698_v18  ;;  %vm1015_vm11 = vweird.f32 %v698_v18 }
 0x1b5   : > { %2580 = vrsqrt.f32 %v697_v0  ;;  %vm1005_vm15 = vweird.f32 %v697_v0 }
 0x1b8   : > { %v431_v44 = vpop.xlane.xlu1 %430 }
 0x1b9   : > { %v488_v7 = vmul.f32 %v3054_v27, %v431_v44 }
 0x1ba   : > { %v2579_v58 = vpop.eup %2578 }
 0x1bb   : > { %v2581_v5 = vpop.eup %2580  ;;  %v1010_v37 = vmul.f32 %v2579_v58, %v698_v18  ;;  %v3638_v20 = vsub.f32 %v2273_v34, %v488_v7  ;;  %vm1016_vm12 = vweird.f32 %v2579_v58 }
 0x1bc   : > { %v1000_v25 = vmul.f32 %v2581_v5, %v697_v0  ;;  %vm1006_vm13 = vweird.f32 %v2581_v5  ;;  %vm1017_vm14 = vmor %vm1015_vm11, %vm1016_vm12 }
 0x1bd   : > { %v1011_v47 = vmul.f32 %v2579_v58, %v1010_v37  ;;  %v552_v2 = vmul.f32 %v3638_v20, %v3638_v20  ;;  %vm1007_vm0 = vmor %vm1005_vm15, %vm1006_vm13  ;;  %v3673_v37 = vperm.slane %v1251_v6, 1 }
 0x1be   : > { %v1001_v24 = vmul.f32 %v2581_v5, %v1000_v25 }
 0x1bf   : > { %v1012_v51 = vmul.f32 0.5, %v1011_v47  ;;  %597 = vadd.xlane.f32.xlu2 %v552_v2 }
 0x1c0   : > { %v1002_v19 = vmul.f32 0.5, %v1001_v24  ;;  %v433_v33 = vpop.xlane.xlu1 %432  ;;  %v590_v50 = vpop.xlane.xlu0 %589  ;;  %v3683_v24 = vld [vmem:[%s2989_s17 + $0x58] sm:$0xff]  }
 0x1c1   : > { %v1013_v63 = vsub.f32 1.5, %v1012_v51  ;;  %v489_v42 = vmul.f32 %v3054_v27, %v433_v33  ;;  %v588_v57 = vpop.xlane.xlu2 %587  ;;  %v644_v32 = vmul.f32 %v590_v50, %v3054_v27 }
 0x1c2   : > { %v1003_v34 = vsub.f32 1.5, %v1002_v19  ;;  %v643_v52 = vmul.f32 %v588_v57, %v3054_v27 }
 0x1c3   : > { %v1014_v49 = vmul.f32 %v2579_v58, %v1013_v63  ;;  %v3647_v56 = vsub.f32 %v2276_v3, %v489_v42  ;;  %v676_v61 = vadd.f32 1e-05, %v644_v32 }
 0x1c4   : > { %v1004_v15 = vmul.f32 %v2581_v5, %v1003_v34  ;;  %v3650_v4 = vadd.f32 1e-05, %v643_v52 }
 0x1c5   : > { %v1018_v36 = vsel %vm1017_vm14, %v2579_v58, %v1014_v49  ;;  %2582 = vrsqrt.f32 %v676_v61  ;;  %v553_v55 = vmul.f32 %v3647_v56, %v3647_v56  ;;  %vm795_vm1 = vweird.f32 %v676_v61 }
 0x1c6   : > { %v1050_v38 = vmul.f32 %v1018_v36, %v3269_v35  ;;  %v1008_v23 = vsel %vm1007_vm0, %v2581_v5, %v1004_v15  ;;  %2584 = vrsqrt.f32 %v3650_v4  ;;  %v3671_v5 = vperm.slane %v1251_v6, 0 }
 0x1c7   : > { %v1049_v3 = vmul.f32 %v1008_v23, %v3285_v11  ;;  %599 = vadd.xlane.f32.xlu2 %v553_v55  ;;  %v2289_v11 = vunpack.c.h.bf16 %v3621_v26  ;;  %v2292_v15 = vunpack.c.l.bf16 %v3683_v24  ;;  %vm785_vm5 = vweird.f32 %v3650_v4 }
 0x1c8   : > { %v1086_v10 = vmul.f32 %v3314_v29, %v1050_v38 }
 0x1c9   : > { %v1085_v53 = vmul.f32 %v3314_v29, %v1049_v3  ;;  %v435_v31 = vpop.xlane.xlu2 %434 }
 0x1ca   : > { %v1122_v30 = vadd.f32 %v3342_v46, %v1086_v10  ;;  %v490_v60 = vmul.f32 %v3054_v27, %v435_v31 }
 0x1cb   : > { %v2583_v35 = vpop.eup %2582  ;;  %v1121_v8 = vadd.f32 %v3342_v46, %v1085_v53  ;;  %v3709_v53 = vperm.slane %v1251_v6, 2 }
 0x1cc   : > { %v2585_v59 = vpop.eup %2584  ;;  %v790_v62 = vmul.f32 %v2583_v35, %v676_v61  ;;  %v3668_v18 = vsub.f32 %v2277_v22, %v490_v60  ;;  %vm796_vm2 = vweird.f32 %v2583_v35 }
 0x1cd   : > { %v2388_v0 = vpack.c.bf16 %v1122_v30, %v1121_v8  ;;  %v780_v44 = vmul.f32 %v2585_v59, %v3650_v4  ;;  %vm786_vm3 = vweird.f32 %v2585_v59  ;;  %vm3696_vm4 = vmor %vm795_vm1, %vm796_vm2 }
 0x1ce   : > { %v791_v25 = vmul.f32 %v2583_v35, %v790_v62  ;;  %v554_v47 = vmul.f32 %v3668_v18, %v3668_v18  ;;  %vm787_vm6 = vmor %vm785_vm5, %vm786_vm3 }
 0x1cf   : > { %v594_v7 = vpop.xlane.xlu1 %593  ;;  %v592_v58 = vpop.xlane.xlu0 %591  ;;  %2419 = vst [vmem:[#allocation2 + $0x28] sm:$0xff] %v2388_v0   ;;  %v781_v22 = vmul.f32 %v2585_v59, %v780_v44  ;;  %446 = vadd.xlane.f32.xlu2 %v2289_v11 }
 0x1d0   : > { %v646_v2 = vmul.f32 %v594_v7, %v3054_v27  ;;  %v645_v40 = vmul.f32 %v592_v58, %v3054_v27  ;;  %v792_v51 = vmul.f32 0.5, %v791_v25  ;;  %601 = vadd.xlane.f32.xlu0 %v554_v47 }
 0x1d1   : > { %v1492_v50 = vpop.f32.mrf.mxu0  ;;  %v1581_v63 = vpop.f32.mrf.mxu1  ;;  %v782_v42 = vmul.f32 0.5, %v781_v22 }
 0x1d2   : > { %v3685_v19 = vadd.f32 1e-05, %v646_v2  ;;  %v3687_v33 = vadd.f32 1e-05, %v645_v40  ;;  %v437_v57 = vpop.xlane.xlu2 %436  ;;  %v1493_v32 = vadd.f32 %v1492_v50, %v3671_v5  ;;  %v1582_v34 = vadd.f32 %v1581_v63, %v3673_v37 }
 0x1d3   : > { %v793_v52 = vsub.f32 1.5, %v792_v51  ;;  %v491_v49 = vmul.f32 %v3054_v27, %v437_v57  ;;  %v783_v36 = vsub.f32 1.5, %v782_v42 }
 0x1d4   : > { %2586 = vrsqrt.f32 %v3685_v19  ;;  %v1750_v38 = vpack.c.bf16 %v1582_v34, %v1493_v32  ;;  %vm815_vm7 = vweird.f32 %v3685_v19  ;;  %vm805_vm9 = vweird.f32 %v3687_v33 }
 0x1d5   : > { %2588 = vrsqrt.f32 %v3687_v33  ;;  %v794_v23 = vmul.f32 %v2583_v35, %v793_v52  ;;  %v3703_v3 = vsub.f32 %v2280_v21, %v491_v49  ;;  %v784_v10 = vmul.f32 %v2585_v59, %v783_v36 }
 0x1d6   : > { %1814 = vst [vmem:[%s3706_s26] sm:$0xff] %v1750_v38  ;;  %v3716_v60 = vld [vmem:[#allocation2 + $0x28] sm:$0xff] }
 0x1d7   : > { %v439_v61 = vpop.xlane.xlu0 %438  ;;  %v798_v31 = vsel %vm3696_vm4, %v2583_v35, %v794_v23  ;;  %v555_v30 = vmul.f32 %v3703_v3, %v3703_v3  ;;  %v788_v8 = vsel %vm787_vm6, %v2585_v59, %v784_v10  ;;  %448 = vadd.xlane.f32.xlu2 %v2292_v15  ;;  %1566 = vmatmul.bf16.gmra.mxu3 %v3716_v60 }
 0x1d8   : > { %v492_v21 = vmul.f32 %v3054_v27, %v439_v61  ;;  %v1028_v4 = vmul.f32 %v798_v31, %v3392_v12  ;;  %v1027_v6 = vmul.f32 %v788_v8, %v3398_v13  ;;  %v1670_v0 = vpop.f32.mrf.mxu2 }
 0x1d9   : > { %603 = vadd.xlane.f32.xlu0 %v555_v30  ;;  %v1494_v44 = vpop.f32.mrf.mxu0  ;;  %v1671_v58 = vadd.f32 %v1670_v0, %v3709_v53  ;;  %v1583_v25 = vpop.f32.mrf.mxu1 }
 0x1da   : > { %v2587_v62 = vpop.eup %2586  ;;  %v3724_v35 = vsub.f32 %v2281_v1, %v492_v21  ;;  %v1064_v59 = vmul.f32 %v3314_v29, %v1028_v4  ;;  %v1063_v47 = vmul.f32 %v3314_v29, %v1027_v6  ;;  %v1495_v17 = vadd.f32 %v1494_v44, %v3671_v5 }
 0x1db   : > { %v2589_v7 = vpop.eup %2588  ;;  %v810_v12 = vmul.f32 %v2587_v62, %v3685_v19  ;;  %v2293_v1 = vunpack.c.h.bf16 %v3683_v24  ;;  %v1751_v22 = vpack.c.bf16 %v1671_v58, %v1671_v58  ;;  %v1584_v51 = vadd.f32 %v1583_v25, %v3673_v37 }
 0x1dc   : > { %v800_v13 = vmul.f32 %v2589_v7, %v3687_v33  ;;  %v1100_v2 = vadd.f32 %v3342_v46, %v1064_v59  ;;  %v1099_v50 = vadd.f32 %v3342_v46, %v1063_v47  ;;  %v556_v42 = vmul.f32 %v3724_v35, %v3724_v35 }
 0x1dd   : > { %v811_v40 = vmul.f32 %v2587_v62, %v810_v12  ;;  %vm816_vm8 = vweird.f32 %v2587_v62  ;;  %1815 = vst [vmem:[%s3706_s26 + $0x8] sm:$0xf] %v1751_v22  ;;  %v1752_v34 = vpack.c.bf16 %v1584_v51, %v1495_v17  ;;  %vm806_vm10 = vweird.f32 %v2589_v7 }
 0x1de   : > { %v801_v63 = vmul.f32 %v2589_v7, %v800_v13  ;;  %v2333_v49 = vpack.c.bf16 %v1100_v2, %v1099_v50  ;;  %605 = vadd.xlane.f32.xlu1 %v556_v42  ;;  %vm817_vm11 = vmor %vm815_vm7, %vm816_vm8 }
 0x1df   : > { %v3740_v57 = vpop.xlane.xlu1 %595  ;;  %v812_v32 = vmul.f32 0.5, %v811_v40  ;;  %v441_v52 = vpop.xlane.xlu0 %440  ;;  %1816 = vst [vmem:[%s3706_s26 + $0xc] sm:$0xff] %v1752_v34  ;;  %vm807_vm12 = vmor %vm805_vm9, %vm806_vm10 }
 0x1e0   : > { %v802_v36 = vmul.f32 0.5, %v801_v63  ;;  %v493_v55 = vmul.f32 %v3054_v27, %v441_v52  ;;  %2408 = vst [vmem:[#allocation2 + $0x50] sm:$0xff] %v2333_v49   ;;  %v1672_v61 = vpop.f32.mrf.mxu2 }
 0x1e1   : > { %v813_v38 = vsub.f32 1.5, %v812_v32  ;;  %450 = vadd.xlane.f32.xlu0 %v2293_v1  ;;  %v1673_v30 = vadd.f32 %v1672_v61, %v3709_v53 }
 0x1e2   : > { %v803_v23 = vsub.f32 1.5, %v802_v36  ;;  %v3752_v10 = vsub.f32 %v2284_v14, %v493_v55  ;;  %v1497_v6 = vpop.f32.mrf.mxu0 }
 0x1e3   : > { %v814_v31 = vmul.f32 %v2587_v62, %v813_v38  ;;  %v1753_v4 = vpack.c.bf16 %v1673_v30, %v1673_v30  ;;  %v1586_v0 = vpop.f32.mrf.mxu1  ;;  %v1498_v59 = vadd.f32 %v1497_v6, %v3671_v5 }
 0x1e4   : > { %v804_v21 = vmul.f32 %v2589_v7, %v803_v23  ;;  %v557_v19 = vmul.f32 %v3752_v10, %v3752_v10  ;;  %v1587_v12 = vadd.f32 %v1586_v0, %v3673_v37 }
 0x1e5   : > { %v818_v8 = vsel %vm817_vm11, %v2587_v62, %v814_v31  ;;  %1817 = vst [vmem:[%s3706_s26 + $0x14] sm:$0xf] %v1753_v4 }
 0x1e6   : > { %v1030_v14 = vmul.f32 %v818_v8, %v3494_v54  ;;  %v808_v44 = vsel %vm807_vm12, %v2589_v7, %v804_v21  ;;  %v1754_v62 = vpack.c.bf16 %v1587_v12, %v1498_v59  ;;  %607 = vadd.xlane.f32.xlu1 %v557_v19 }
 0x1e7   : > { %v443_v33 = vpop.xlane.xlu1 %442  ;;  %v1029_v58 = vmul.f32 %v808_v44, %v3498_v16  ;;  %v2210_v7 = vld [vmem:[#allocation2 + $0x50] sm:$0xff]  ;;  %1640 = vmatmul.bf16.vlgmr.msrb.gmra.mxu3 %v3468_v39 }
 0x1e8   : > { %v494_v25 = vmul.f32 %v3054_v27, %v443_v33  ;;  %v1066_v47 = vmul.f32 %v3314_v29, %v1030_v14  ;;  %1818 = vst [vmem:[%s3706_s26 + $0x18] sm:$0xff] %v1754_v62  ;;  %1511 = vmatmul.bf16.gmra.mxu0 %v2210_v7  ;;  %1600 = vmatmul.bf16.gmra.mxu1 %v2210_v7 }
 0x1e9   : > { %v1065_v13 = vmul.f32 %v3314_v29, %v1029_v58  ;;  %1689 = vmatmul.bf16.gmra.mxu2 %v2210_v7 }
 0x1ea   : > { %v3769_v54 = vsub.f32 %v2285_v41, %v494_v25  ;;  %v1102_v17 = vadd.f32 %v3342_v46, %v1066_v47  ;;  %v1675_v29 = vpop.f32.mrf.mxu2  ;;  %v1499_v40 = vpop.f32.mrf.mxu0 }
 0x1eb   : > { %v1101_v16 = vadd.f32 %v3342_v46, %v1065_v13  ;;  %v1676_v41 = vadd.f32 %v1675_v29, %v3709_v53  ;;  %v1588_v22 = vpop.f32.mrf.mxu1  ;;  %v1500_v51 = vadd.f32 %v1499_v40, %v3671_v5 }
 0x1ec   : > { %v558_v2 = vmul.f32 %v3769_v54, %v3769_v54  ;;  %v1589_v50 = vadd.f32 %v1588_v22, %v3673_v37 }
 0x1ed   : > { %v2338_v43 = vpack.c.bf16 %v1102_v17, %v1101_v16  ;;  %v1755_v63 = vpack.c.bf16 %v1676_v41, %v1676_v41 }
 0x1ee   : > { %609 = vadd.xlane.f32.xlu2 %v558_v2  ;;  %v1756_v32 = vpack.c.bf16 %v1589_v50, %v1500_v51 }
 0x1ef   : > { %v445_v46 = vpop.xlane.xlu1 %444  ;;  %2409 = vst [vmem:[#allocation2 + $0x68] sm:$0xff] %v2338_v43  }
 0x1f0   : > { %v495_v42 = vmul.f32 %v3054_v27, %v445_v46  ;;  %1819 = vst [vmem:[%s3706_s26 + $0x20] sm:$0xf] %v1755_v63  ;;  %v647_v46 = vmul.f32 %v3740_v57, %v3054_v27  ;;  %v3816_v63 = vpop.f32.mrf.mxu3 }
 0x1f1   : > { %1820 = vst [vmem:[%s3706_s26 + $0x24] sm:$0xff] %v1756_v32 }
 0x1f2   : > { %v3784_v34 = vsub.f32 %v2288_v28, %v495_v42  ;;  %v1677_v49 = vpop.f32.mrf.mxu2  ;;  %v679_v42 = vadd.f32 1e-05, %v647_v46 }
 0x1f3   : > { %v1678_v36 = vadd.f32 %v1677_v49, %v3709_v53  ;;  %v1502_v55 = vpop.f32.mrf.mxu0 }
 0x1f4   : > { %v559_v52 = vmul.f32 %v3784_v34, %v3784_v34  ;;  %v1591_v38 = vpop.f32.mrf.mxu1  ;;  %v1503_v23 = vadd.f32 %v1502_v55, %v3671_v5  ;;  %2590 = vrsqrt.f32 %v679_v42  ;;  %vm825_vm13 = vweird.f32 %v679_v42 }
 0x1f5   : > { %v1592_v61 = vadd.f32 %v1591_v38, %v3673_v37  ;;  %v1757_v31 = vpack.c.bf16 %v1678_v36, %v1678_v36 }
 0x1f6   : > { %611 = vadd.xlane.f32.xlu0 %v559_v52  ;;  %v2211_v30 = vld [vmem:[#allocation2 + $0x68] sm:$0xff] }
 0x1f7   : > { %v1758_v21 = vpack.c.bf16 %v1592_v61, %v1503_v23  ;;  %1821 = vst [vmem:[%s3706_s26 + $0x2c] sm:$0xf] %v1757_v31  ;;  %1645 = vmatmul.bf16.gmra.mxu3 %v3569_v9 }
 0x1f8   : > { %1516 = vmatmul.bf16.gmra.mxu0 %v2211_v30  ;;  %1605 = vmatmul.bf16.gmra.mxu1 %v2211_v30  ;;  %v3819_v52 = vpop.f32.mrf.mxu3 }
 0x1f9   : > { %1822 = vst [vmem:[%s3706_s26 + $0x30] sm:$0xff] %v1758_v21  ;;  %1694 = vmatmul.bf16.gmra.mxu2 %v2211_v30 }
 0x1fa   : > { %v1680_v28 = vpop.f32.mrf.mxu2  ;;  %v2591_v32 = vpop.eup %2590 }
 0x1fb   : > { %v1681_v19 = vadd.f32 %v1680_v28, %v3709_v53  ;;  %v1504_v8 = vpop.f32.mrf.mxu0  ;;  %v820_v49 = vmul.f32 %v2591_v32, %v679_v42  ;;  %vm826_vm14 = vweird.f32 %v2591_v32 }
 0x1fc   : > { %v1593_v4 = vpop.f32.mrf.mxu1  ;;  %v1505_v6 = vadd.f32 %v1504_v8, %v3671_v5  ;;  %vm827_vm15 = vmor %vm825_vm13, %vm826_vm14 }
 0x1fd   : > { %v1594_v0 = vadd.f32 %v1593_v4, %v3673_v37  ;;  %v1759_v14 = vpack.c.bf16 %v1681_v19, %v1681_v19  ;;  %v821_v36 = vmul.f32 %v2591_v32, %v820_v49 }
 0x1ff   : > { %v1760_v44 = vpack.c.bf16 %v1594_v0, %v1505_v6  ;;  %1823 = vst [vmem:[%s3706_s26 + $0x38] sm:$0xf] %v1759_v14  ;;  %v822_v31 = vmul.f32 0.5, %v821_v36 }
 0x200   : > { %v3822_v23 = vpop.f32.mrf.mxu3 }
 0x201   : > { %1824 = vst [vmem:[%s3706_s26 + $0x3c] sm:$0xff] %v1760_v44  ;;  %v823_v57 = vsub.f32 1.5, %v822_v31 }
 0x202   : > { %v1682_v59 = vpop.f32.mrf.mxu2 }
 0x203   : > { %v1683_v12 = vadd.f32 %v1682_v59, %v3709_v53  ;;  %v1507_v33 = vpop.f32.mrf.mxu0  ;;  %v824_v19 = vmul.f32 %v2591_v32, %v823_v57 }
 0x204   : > { %v1596_v58 = vpop.f32.mrf.mxu1  ;;  %v1508_v25 = vadd.f32 %v1507_v33, %v3671_v5 }
 0x205   : > { %v1597_v47 = vadd.f32 %v1596_v58, %v3673_v37  ;;  %v1761_v62 = vpack.c.bf16 %v1683_v12, %v1683_v12  ;;  %v828_v0 = vsel %vm827_vm15, %v2591_v32, %v824_v19 }
 0x207   : > { %v1762_v13 = vpack.c.bf16 %v1597_v47, %v1508_v25  ;;  %1825 = vst [vmem:[%s3706_s26 + $0x44] sm:$0xf] %v1761_v62  ;;  %1650 = vmatmul.bf16.gmra.mxu3 %v3623_v45  ;;  %v1031_v25 = vmul.f32 %v828_v0, %v3585_v48 }
 0x208   : > { %v3826_v4 = vpop.f32.mrf.mxu3 }
 0x209   : > { %1826 = vst [vmem:[%s3706_s26 + $0x48] sm:$0xff] %v1762_v13 }
 0x20a   : > { %v1685_v7 = vpop.f32.mrf.mxu2 }
 0x20b   : > { %v1686_v17 = vadd.f32 %v1685_v7, %v3709_v53  ;;  %v1509_v16 = vpop.f32.mrf.mxu0 }
 0x20c   : > { %v1598_v2 = vpop.f32.mrf.mxu1  ;;  %v1510_v29 = vadd.f32 %v1509_v16, %v3671_v5 }
 0x20d   : > { %v1599_v43 = vadd.f32 %v1598_v2, %v3673_v37  ;;  %v1763_v41 = vpack.c.bf16 %v1686_v17, %v1686_v17 }
 0x20f   : > { %v1764_v40 = vpack.c.bf16 %v1599_v43, %v1510_v29  ;;  %1827 = vst [vmem:[%s3706_s26 + $0x50] sm:$0xf] %v1763_v41  ;;  %v3838_v29 = vld [vmem:[#allocation6] ss:$0 sm:$0xff] }
 0x210   : > { %v1067_v48 = vmul.f32 %v3838_v29, %v1031_v25  ;;  %v3841_v26 = vpop.f32.mrf.mxu3 }
 0x211   : > { %1828 = vst [vmem:[%s3706_s26 + $0x54] sm:$0xff] %v1764_v40 }
 0x212   : > { %v1687_v22 = vpop.f32.mrf.mxu2 }
 0x213   : > { %v1688_v51 = vadd.f32 %v1687_v22, %v3709_v53 }
 0x215   : > { %v1765_v50 = vpack.c.bf16 %v1688_v51, %v1688_v51 }
 0x217   : > { %1829 = vst [vmem:[%s3706_s26 + $0x5c] sm:$0xf] %v1765_v50  ;;  %1655 = vmatmul.bf16.gmra.mxu3 %v3716_v60 }
 0x227   : > { %1729 = vmatmul.bf16.vlgmr.msra.gmra.mxu3 %v3468_v39 }
 0x232   : > { %v598_v55 = vpop.xlane.xlu2 %597 }
 0x233   : > { %v648_v38 = vmul.f32 %v598_v55, %v3054_v27 }
 0x235   : > { %v680_v61 = vadd.f32 1e-05, %v648_v38 }
 0x237   : > { %2592 = vrsqrt.f32 %v680_v61  ;;  %1734 = vmatmul.bf16.gmra.mxu3 %v3569_v9  ;;  %vm835_vm1 = vweird.f32 %v680_v61 }
 0x23a   : > { %v600_v30 = vpop.xlane.xlu2 %599 }
 0x23b   : > { %v649_v21 = vmul.f32 %v600_v30, %v3054_v27 }
 0x23d   : > { %v2593_v39 = vpop.eup %2592  ;;  %v681_v28 = vadd.f32 1e-05, %v649_v21 }
 0x23e   : > { %v830_v8 = vmul.f32 %v2593_v39, %v680_v61  ;;  %vm836_vm0 = vweird.f32 %v2593_v39 }
 0x23f   : > { %2594 = vrsqrt.f32 %v681_v28  ;;  %vm837_vm2 = vmor %vm835_vm1, %vm836_vm0  ;;  %vm845_vm4 = vweird.f32 %v681_v28 }
 0x240   : > { %v831_v6 = vmul.f32 %v2593_v39, %v830_v8 }
 0x242   : > { %v832_v14 = vmul.f32 0.5, %v831_v6  ;;  %v447_v44 = vpop.xlane.xlu2 %446 }
 0x243   : > { %v496_v9 = vmul.f32 %v3054_v27, %v447_v44  ;;  %v602_v59 = vpop.xlane.xlu0 %601 }
 0x244   : > { %v833_v12 = vsub.f32 1.5, %v832_v14  ;;  %v650_v33 = vmul.f32 %v602_v59, %v3054_v27 }
 0x245   : > { %v2595_v58 = vpop.eup %2594  ;;  %v3833_v47 = vsub.f32 %v2289_v11, %v496_v9 }
 0x246   : > { %v834_v62 = vmul.f32 %v2593_v39, %v833_v12  ;;  %v840_v13 = vmul.f32 %v2595_v58, %v681_v28  ;;  %v682_v7 = vadd.f32 1e-05, %v650_v33  ;;  %vm846_vm3 = vweird.f32 %v2595_v58 }
 0x247   : > { %v560_v17 = vmul.f32 %v3833_v47, %v3833_v47  ;;  %1739 = vmatmul.bf16.gmra.mxu3 %v3623_v45  ;;  %v3847_v45 = vld [vmem:[#allocation8] ss:$0 sm:$0xff]  ;;  %vm847_vm5 = vmor %vm845_vm4, %vm846_vm3 }
 0x248   : > { %v838_v16 = vsel %vm837_vm2, %v2593_v39, %v834_v62  ;;  %v841_v2 = vmul.f32 %v2595_v58, %v840_v13  ;;  %2596 = vrsqrt.f32 %v682_v7  ;;  %v1103_v42 = vadd.f32 %v3847_v45, %v1067_v48 }
 0x249   : > { %v1032_v11 = vmul.f32 %v838_v16, %v3638_v20  ;;  %613 = vadd.xlane.f32.xlu1 %v560_v17  ;;  %vm855_vm7 = vweird.f32 %v682_v7 }
 0x24a   : > { %v842_v43 = vmul.f32 0.5, %v841_v2  ;;  %v449_v41 = vpop.xlane.xlu2 %448 }
 0x24b   : > { %v1068_v40 = vmul.f32 %v3838_v29, %v1032_v11  ;;  %v497_v22 = vmul.f32 %v3054_v27, %v449_v41 }
 0x24c   : > { %v604_v51 = vpop.xlane.xlu0 %603  ;;  %v843_v50 = vsub.f32 1.5, %v842_v43 }
 0x24d   : > { %v651_v46 = vmul.f32 %v604_v51, %v3054_v27  ;;  %v1104_v32 = vadd.f32 %v3847_v45, %v1068_v40  ;;  %v3853_v20 = vsub.f32 %v2292_v15, %v497_v22  ;;  %v3858_v15 = vpop.f32.mrf.mxu3 }
 0x24e   : > { %v2597_v49 = vpop.eup %2596  ;;  %v844_v38 = vmul.f32 %v2595_v58, %v843_v50 }
 0x24f   : > { %v683_v36 = vadd.f32 1e-05, %v651_v46  ;;  %v2343_v55 = vpack.c.bf16 %v1104_v32, %v1103_v42  ;;  %v850_v61 = vmul.f32 %v2597_v49, %v682_v7  ;;  %v561_v31 = vmul.f32 %v3853_v20, %v3853_v20 }
 0x250   : > { %v848_v39 = vsel %vm847_vm5, %v2595_v58, %v844_v38  ;;  %vm856_vm6 = vweird.f32 %v2597_v49 }
 0x251   : > { %2598 = vrsqrt.f32 %v683_v36  ;;  %2410 = vst [vmem:[#allocation2 + $0x8] sm:$0xff] %v2343_v55   ;;  %v851_v57 = vmul.f32 %v2597_v49, %v850_v61  ;;  %615 = vadd.xlane.f32.xlu2 %v561_v31  ;;  %v606_v30 = vpop.xlane.xlu1 %605  ;;  %v1033_v9 = vmul.f32 %v848_v39, %v3647_v56  ;;  %vm857_vm8 = vmor %vm855_vm7, %vm856_vm6  ;;  %vm865_vm10 = vweird.f32 %v683_v36 }
 0x252   : > { %v652_v21 = vmul.f32 %v606_v30, %v3054_v27 }
 0x253   : > { %v852_v19 = vmul.f32 0.5, %v851_v57  ;;  %v1069_v56 = vmul.f32 %v3838_v29, %v1033_v9 }
 0x254   : > { %v451_v8 = vpop.xlane.xlu0 %450  ;;  %v684_v6 = vadd.f32 1e-05, %v652_v21 }
 0x255   : > { %v498_v0 = vmul.f32 %v3054_v27, %v451_v8  ;;  %v853_v14 = vsub.f32 1.5, %v852_v19  ;;  %v1105_v43 = vadd.f32 %v3847_v45, %v1069_v56  ;;  %v1553_v56 = vadd.f32 %v3816_v63, %v3671_v5 }
 0x256   : > { %2600 = vrsqrt.f32 %v684_v6  ;;  %vm875_vm12 = vweird.f32 %v684_v6 }
 0x257   : > { %v2599_v44 = vpop.eup %2598  ;;  %v3864_v28 = vsub.f32 %v2293_v1, %v498_v0  ;;  %v854_v59 = vmul.f32 %v2597_v49, %v853_v14  ;;  %1744 = vmatmul.bf16.gmra.mxu3 %v3716_v60 }
 0x258   : > { %v860_v12 = vmul.f32 %v2599_v44, %v683_v36  ;;  %v2212_v58 = vld [vmem:[#allocation2 + $0x8] sm:$0xff]  ;;  %vm866_vm9 = vweird.f32 %v2599_v44 }
 0x259   : > { %v562_v33 = vmul.f32 %v3864_v28, %v3864_v28  ;;  %v858_v25 = vsel %vm857_vm8, %v2597_v49, %v854_v59  ;;  %v608_v13 = vpop.xlane.xlu1 %607  ;;  %1521 = vmatmul.bf16.gmra.mxu0 %v2212_v58  ;;  %1610 = vmatmul.bf16.gmra.mxu1 %v2212_v58  ;;  %vm867_vm11 = vmor %vm865_vm10, %vm866_vm9 }
 0x25a   : > { %v861_v62 = vmul.f32 %v2599_v44, %v860_v12  ;;  %v1034_v17 = vmul.f32 %v858_v25, %v3668_v18  ;;  %v653_v24 = vmul.f32 %v608_v13, %v3054_v27  ;;  %1699 = vmatmul.bf16.gmra.mxu2 %v2212_v58  ;;  %v3872_v7 = vpop.f32.mrf.mxu3 }
 0x25b   : > { %617 = vadd.xlane.f32.xlu0 %v562_v33 }
 0x25c   : > { %v862_v1 = vmul.f32 0.5, %v861_v62  ;;  %v2601_v60 = vpop.eup %2600  ;;  %v1070_v16 = vmul.f32 %v3838_v29, %v1034_v17  ;;  %v685_v2 = vadd.f32 1e-05, %v653_v24 }
 0x25d   : > { %v870_v11 = vmul.f32 %v2601_v60, %v684_v6  ;;  %vm876_vm13 = vweird.f32 %v2601_v60 }
 0x25e   : > { %v863_v48 = vsub.f32 1.5, %v862_v1  ;;  %v1106_v18 = vadd.f32 %v3847_v45, %v1070_v16  ;;  %2602 = vrsqrt.f32 %v685_v2  ;;  %vm877_vm14 = vmor %vm875_vm12, %vm876_vm13  ;;  %vm885_vm15 = vweird.f32 %v685_v2 }
 0x25f   : > { %v871_v22 = vmul.f32 %v2601_v60, %v870_v11 }
 0x260   : > { %v864_v40 = vmul.f32 %v2599_v44, %v863_v48  ;;  %v2348_v50 = vpack.c.bf16 %v1106_v18, %v1105_v43 }
 0x261   : > { %v610_v41 = vpop.xlane.xlu2 %609  ;;  %v872_v42 = vmul.f32 0.5, %v871_v22 }
 0x262   : > { %v654_v51 = vmul.f32 %v610_v41, %v3054_v27  ;;  %v868_v46 = vsel %vm867_vm11, %v2599_v44, %v864_v40  ;;  %2411 = vst [vmem:[#allocation2 + $0x48] sm:$0xff] %v2348_v50   ;;  %v3878_v55 = vpop.f32.mrf.mxu3 }
 0x263   : > { %v873_v49 = vsub.f32 1.5, %v872_v42  ;;  %v1035_v61 = vmul.f32 %v868_v46, %v3703_v3 }
 0x264   : > { %v686_v32 = vadd.f32 1e-05, %v654_v51  ;;  %v2603_v38 = vpop.eup %2602 }
 0x265   : > { %v874_v36 = vmul.f32 %v2601_v60, %v873_v49  ;;  %v880_v31 = vmul.f32 %v2603_v38, %v685_v2  ;;  %v1512_v57 = vpop.f32.mrf.mxu0  ;;  %v1601_v30 = vpop.f32.mrf.mxu1  ;;  %v1071_v6 = vmul.f32 %v3838_v29, %v1035_v61  ;;  %vm886_vm0 = vweird.f32 %v2603_v38 }
 0x266   : > { %2604 = vrsqrt.f32 %v686_v32  ;;  %v1513_v19 = vadd.f32 %v1512_v57, %v3671_v5  ;;  %v1602_v8 = vadd.f32 %v1601_v30, %v3673_v37  ;;  %vm3889_vm1 = vmor %vm885_vm15, %vm886_vm0  ;;  %vm895_vm2 = vweird.f32 %v686_v32 }
 0x267   : > { %v878_v21 = vsel %vm877_vm14, %v2601_v60, %v874_v36  ;;  %v881_v39 = vmul.f32 %v2603_v38, %v880_v31  ;;  %v1107_v25 = vadd.f32 %v3847_v45, %v1071_v6  ;;  %v1555_v49 = vadd.f32 %v3819_v52, %v3671_v5 }
 0x268   : > { %v1036_v0 = vmul.f32 %v878_v21, %v3724_v35  ;;  %v1766_v3 = vpack.c.bf16 %v1602_v8, %v1513_v19 }
 0x269   : > { %v882_v44 = vmul.f32 0.5, %v881_v39  ;;  %v2213_v9 = vld [vmem:[#allocation2 + $0x48] sm:$0xff] }
 0x26a   : > { %v1072_v59 = vmul.f32 %v3838_v29, %v1036_v0  ;;  %1830 = vst [vmem:[%s3706_s26 + $0x60] sm:$0xff] %v1766_v3  ;;  %1526 = vmatmul.bf16.gmra.mxu0 %v2213_v9  ;;  %1615 = vmatmul.bf16.gmra.mxu1 %v2213_v9  ;;  %v1641_v58 = vpop.f32.mrf.mxu3 }
 0x26b   : > { %v883_v33 = vsub.f32 1.5, %v882_v44  ;;  %1704 = vmatmul.bf16.gmra.mxu2 %v2213_v9  ;;  %v1642_v24 = vadd.f32 %v1641_v58, %v3673_v37  ;;  %v1558_v9 = vadd.f32 %v3822_v23, %v3671_v5 }
 0x26c   : > { %v2605_v14 = vpop.eup %2604  ;;  %v1108_v62 = vadd.f32 %v3847_v45, %v1072_v59  ;;  %v1690_v1 = vpop.f32.mrf.mxu2 }
 0x26d   : > { %v890_v12 = vmul.f32 %v2605_v14, %v686_v32  ;;  %v884_v17 = vmul.f32 %v2603_v38, %v883_v33  ;;  %vm896_vm3 = vweird.f32 %v2605_v14  ;;  %v1691_v2 = vadd.f32 %v1690_v1, %v3709_v53  ;;  %v1514_v48 = vpop.f32.mrf.mxu0  ;;  %v1603_v11 = vpop.f32.mrf.mxu1 }
 0x26e   : > { %v2353_v60 = vpack.c.bf16 %v1108_v62, %v1107_v25  ;;  %v1798_v18 = vpack.c.bf16 %v1642_v24, %v1553_v56  ;;  %v1515_v63 = vadd.f32 %v1514_v48, %v3671_v5  ;;  %v1604_v41 = vadd.f32 %v1603_v11, %v3673_v37  ;;  %vm897_vm4 = vmor %vm895_vm2, %vm896_vm3 }
 0x26f   : > { %v891_v13 = vmul.f32 %v2605_v14, %v890_v12  ;;  %v888_v43 = vsel %vm3889_vm1, %v2603_v38, %v884_v17  ;;  %v1767_v22 = vpack.c.bf16 %v1691_v2, %v1691_v2  ;;  %v1560_v24 = vadd.f32 %v3826_v4, %v3671_v5 }
 0x270   : > { %2412 = vst [vmem:[#allocation2 + $0x40] sm:$0xff] %v2353_v60   ;;  %v1037_v51 = vmul.f32 %v888_v43, %v3752_v10  ;;  %v1768_v50 = vpack.c.bf16 %v1604_v41, %v1515_v63 }
 0x271   : > { %v892_v16 = vmul.f32 0.5, %v891_v13  ;;  %1862 = vst [vmem:[%s3706_s26 + $0x120] sm:$0xff] %v1798_v18  ;;  %v1563_v18 = vadd.f32 %v3841_v26, %v3671_v5 }
 0x272   : > { %1831 = vst [vmem:[%s3706_s26 + $0x68] sm:$0xf] %v1767_v22  ;;  %v1643_v42 = vpop.f32.mrf.mxu3  ;;  %v1073_v36 = vmul.f32 %v3838_v29, %v1037_v51 }
 0x273   : > { %v893_v40 = vsub.f32 1.5, %v892_v16  ;;  %1832 = vst [vmem:[%s3706_s26 + $0x6c] sm:$0xff] %v1768_v50  ;;  %v1644_v61 = vadd.f32 %v1643_v42, %v3673_v37 }
 0x274   : > { %v1692_v32 = vpop.f32.mrf.mxu2  ;;  %v1109_v0 = vadd.f32 %v3847_v45, %v1073_v36 }
 0x275   : > { %v894_v46 = vmul.f32 %v2605_v14, %v893_v40  ;;  %v1800_v31 = vpack.c.bf16 %v1644_v61, %v1555_v49  ;;  %v1693_v57 = vadd.f32 %v1692_v32, %v3709_v53  ;;  %v1517_v30 = vpop.f32.mrf.mxu0  ;;  %v1606_v21 = vpop.f32.mrf.mxu1  ;;  %v1565_v40 = vadd.f32 %v3858_v15, %v3671_v5 }
 0x276   : > { %v1518_v19 = vadd.f32 %v1517_v30, %v3671_v5  ;;  %v1607_v52 = vadd.f32 %v1606_v21, %v3673_v37  ;;  %v612_v61 = vpop.xlane.xlu0 %611 }
 0x277   : > { %v898_v38 = vsel %vm897_vm4, %v2605_v14, %v894_v46  ;;  %v2214_v8 = vld [vmem:[#allocation2 + $0x40] sm:$0xff]  ;;  %1864 = vst [vmem:[%s3706_s26 + $0x12c] sm:$0xff] %v1800_v31  ;;  %v1769_v6 = vpack.c.bf16 %v1693_v57, %v1693_v57  ;;  %v1568_v46 = vadd.f32 %v3872_v7, %v3671_v5 }
 0x278   : > { %v1038_v10 = vmul.f32 %v898_v38, %v3769_v54  ;;  %v1770_v14 = vpack.c.bf16 %v1607_v52, %v1518_v19  ;;  %v1570_v38 = vadd.f32 %v3878_v55, %v3671_v5 }
 0x279   : > { %1833 = vst [vmem:[%s3706_s26 + $0x74] sm:$0xf] %v1769_v6 }
 0x27a   : > { %v1074_v39 = vmul.f32 %v3838_v29, %v1038_v10  ;;  %1834 = vst [vmem:[%s3706_s26 + $0x78] sm:$0xff] %v1770_v14  ;;  %1531 = vmatmul.bf16.gmra.mxu0 %v2214_v8  ;;  %1620 = vmatmul.bf16.gmra.mxu1 %v2214_v8  ;;  %v1646_v3 = vpop.f32.mrf.mxu3  ;;  %v655_v10 = vmul.f32 %v612_v61, %v3054_v27 }
 0x27b   : > { %1709 = vmatmul.bf16.gmra.mxu2 %v2214_v8  ;;  %v1647_v59 = vadd.f32 %v1646_v3, %v3673_v37 }
 0x27c   : > { %v1110_v54 = vadd.f32 %v3847_v45, %v1074_v39  ;;  %v1695_v12 = vpop.f32.mrf.mxu2  ;;  %v687_v32 = vadd.f32 1e-05, %v655_v10 }
 0x27d   : > { %v1802_v33 = vpack.c.bf16 %v1647_v59, %v1558_v9  ;;  %v1696_v58 = vadd.f32 %v1695_v12, %v3709_v53  ;;  %v1519_v25 = vpop.f32.mrf.mxu0  ;;  %v1608_v62 = vpop.f32.mrf.mxu1 }
 0x27e   : > { %v2358_v44 = vpack.c.bf16 %v1110_v54, %v1109_v0  ;;  %v1520_v35 = vadd.f32 %v1519_v25, %v3671_v5  ;;  %v1609_v13 = vadd.f32 %v1608_v62, %v3673_v37  ;;  %2606 = vrsqrt.f32 %v687_v32 }
 0x27f   : > { %1866 = vst [vmem:[%s3706_s26 + $0x138] sm:$0xff] %v1802_v33  ;;  %v1771_v56 = vpack.c.bf16 %v1696_v58, %v1696_v58  ;;  %vm905_vm5 = vweird.f32 %v687_v32 }
 0x280   : > { %2413 = vst [vmem:[#allocation2 + $0x20] sm:$0xff] %v2358_v44   ;;  %v1772_v17 = vpack.c.bf16 %v1609_v13, %v1520_v35 }
 0x281   : > { %1835 = vst [vmem:[%s3706_s26 + $0x80] sm:$0xf] %v1771_v56 }
 0x282   : > { %1836 = vst [vmem:[%s3706_s26 + $0x84] sm:$0xff] %v1772_v17  ;;  %v1648_v23 = vpop.f32.mrf.mxu3 }
 0x283   : > { %v1649_v1 = vadd.f32 %v1648_v23, %v3673_v37 }
 0x284   : > { %v1697_v60 = vpop.f32.mrf.mxu2  ;;  %v2607_v55 = vpop.eup %2606 }
 0x285   : > { %v1804_v16 = vpack.c.bf16 %v1649_v1, %v1560_v24  ;;  %v1698_v2 = vadd.f32 %v1697_v60, %v3709_v53  ;;  %v900_v19 = vmul.f32 %v2607_v55, %v687_v32  ;;  %vm906_vm6 = vweird.f32 %v2607_v55 }
 0x286   : > { %vm907_vm7 = vmor %vm905_vm5, %vm906_vm6 }
 0x287   : > { %v2215_v48 = vld [vmem:[#allocation2 + $0x20] sm:$0xff]  ;;  %1868 = vst [vmem:[%s3706_s26 + $0x144] sm:$0xff] %v1804_v16  ;;  %v1773_v11 = vpack.c.bf16 %v1698_v2, %v1698_v2  ;;  %v901_v8 = vmul.f32 %v2607_v55, %v900_v19 }
 0x289   : > { %1837 = vst [vmem:[%s3706_s26 + $0x8c] sm:$0xf] %v1773_v11  ;;  %v902_v3 = vmul.f32 0.5, %v901_v8 }
 0x28a   : > { %1536 = vmatmul.bf16.gmra.mxu0 %v2215_v48  ;;  %1625 = vmatmul.bf16.gmra.mxu1 %v2215_v48  ;;  %v1651_v43 = vpop.f32.mrf.mxu3 }
 0x28b   : > { %1714 = vmatmul.bf16.gmra.mxu2 %v2215_v48  ;;  %v1652_v4 = vadd.f32 %v1651_v43, %v3673_v37  ;;  %v903_v59 = vsub.f32 1.5, %v902_v3 }
 0x28d   : > { %v1806_v63 = vpack.c.bf16 %v1652_v4, %v1563_v18  ;;  %v904_v13 = vmul.f32 %v2607_v55, %v903_v59 }
 0x28f   : > { %1870 = vst [vmem:[%s3706_s26 + $0x150] sm:$0xff] %v1806_v63  ;;  %v908_v24 = vsel %vm907_vm7, %v2607_v55, %v904_v13 }
 0x290   : > { %v1039_v18 = vmul.f32 %v908_v24, %v3784_v34 }
 0x292   : > { %v1653_v41 = vpop.f32.mrf.mxu3 }
 0x293   : > { %v1654_v22 = vadd.f32 %v1653_v41, %v3673_v37 }
 0x295   : > { %v1808_v51 = vpack.c.bf16 %v1654_v22, %v1565_v40 }
 0x297   : > { %1872 = vst [vmem:[%s3706_s26 + $0x15c] sm:$0xff] %v1808_v51  ;;  %v1075_v51 = vmul.f32 %v3838_v29, %v1039_v18 }
 0x29a   : > { %v1656_v50 = vpop.f32.mrf.mxu3 }
 0x29b   : > { %v1657_v26 = vadd.f32 %v1656_v50, %v3673_v37 }
 0x29d   : > { %v1810_v42 = vpack.c.bf16 %v1657_v26, %v1568_v46 }
 0x29f   : > { %1874 = vst [vmem:[%s3706_s26 + $0x168] sm:$0xff] %v1810_v42 }
 0x2a2   : > { %v1658_v49 = vpop.f32.mrf.mxu3 }
 0x2a3   : > { %v1659_v15 = vadd.f32 %v1658_v49, %v3673_v37 }
 0x2a5   : > { %v1812_v36 = vpack.c.bf16 %v1659_v15, %v1570_v38  ;;  %v1111_v38 = vadd.f32 %v3847_v45, %v1075_v51 }
 0x2a7   : > { %1876 = vst [vmem:[%s3706_s26 + $0x174] sm:$0xff] %v1812_v36 }
 0x2aa   : > { %v1730_v31 = vpop.f32.mrf.mxu3 }
 0x2ab   : > { %v1731_v7 = vadd.f32 %v1730_v31, %v3709_v53 }
 0x2ad   : > { %v1799_v57 = vpack.c.bf16 %v1731_v7, %v1731_v7 }
 0x2af   : > { %1863 = vst [vmem:[%s3706_s26 + $0x128] sm:$0xf] %v1799_v57 }
 0x2b2   : > { %v1732_v30 = vpop.f32.mrf.mxu3 }
 0x2b3   : > { %v1733_v21 = vadd.f32 %v1732_v30, %v3709_v53 }
 0x2b5   : > { %v1801_v39 = vpack.c.bf16 %v1733_v21, %v1733_v21 }
 0x2b7   : > { %1865 = vst [vmem:[%s3706_s26 + $0x134] sm:$0xf] %v1801_v39 }
 0x2ba   : > { %v1735_v52 = vpop.f32.mrf.mxu3 }
 0x2bb   : > { %v1736_v6 = vadd.f32 %v1735_v52, %v3709_v53 }
 0x2bc   : > { %v614_v0 = vpop.xlane.xlu1 %613 }
 0x2bd   : > { %v656_v54 = vmul.f32 %v614_v0, %v3054_v27  ;;  %v1803_v14 = vpack.c.bf16 %v1736_v6, %v1736_v6 }
 0x2bf   : > { %v688_v44 = vadd.f32 1e-05, %v656_v54  ;;  %1867 = vst [vmem:[%s3706_s26 + $0x140] sm:$0xf] %v1803_v14 }
 0x2c1   : > { %2608 = vrsqrt.f32 %v688_v44  ;;  %vm915_vm9 = vweird.f32 %v688_v44 }
 0x2c2   : > { %v1737_v9 = vpop.f32.mrf.mxu3 }
 0x2c3   : > { %v1738_v12 = vadd.f32 %v1737_v9, %v3709_v53 }
 0x2c4   : > { %v616_v33 = vpop.xlane.xlu2 %615 }
 0x2c5   : > { %v657_v58 = vmul.f32 %v616_v33, %v3054_v27  ;;  %v1805_v25 = vpack.c.bf16 %v1738_v12, %v1738_v12 }
 0x2c7   : > { %v2609_v62 = vpop.eup %2608  ;;  %v689_v35 = vadd.f32 1e-05, %v657_v58  ;;  %1869 = vst [vmem:[%s3706_s26 + $0x14c] sm:$0xf] %v1805_v25 }
 0x2c8   : > { %v910_v56 = vmul.f32 %v2609_v62, %v688_v44  ;;  %vm916_vm8 = vweird.f32 %v2609_v62 }
 0x2c9   : > { %2610 = vrsqrt.f32 %v689_v35  ;;  %vm917_vm10 = vmor %vm915_vm9, %vm916_vm8  ;;  %vm925_vm11 = vweird.f32 %v689_v35 }
 0x2ca   : > { %v911_v17 = vmul.f32 %v2609_v62, %v910_v56  ;;  %v1740_v23 = vpop.f32.mrf.mxu3 }
 0x2cb   : > { %v1741_v60 = vadd.f32 %v1740_v23, %v3709_v53 }
 0x2cc   : > { %v912_v1 = vmul.f32 0.5, %v911_v17 }
 0x2cd   : > { %v1807_v48 = vpack.c.bf16 %v1741_v60, %v1741_v60 }
 0x2ce   : > { %v618_v16 = vpop.xlane.xlu0 %617  ;;  %v913_v2 = vsub.f32 1.5, %v912_v1 }
 0x2cf   : > { %v658_v11 = vmul.f32 %v618_v16, %v3054_v27  ;;  %v2611_v43 = vpop.eup %2610  ;;  %1871 = vst [vmem:[%s3706_s26 + $0x158] sm:$0xf] %v1807_v48 }
 0x2d0   : > { %v914_v4 = vmul.f32 %v2609_v62, %v913_v2  ;;  %v920_v63 = vmul.f32 %v2611_v43, %v689_v35  ;;  %vm926_vm12 = vweird.f32 %v2611_v43 }
 0x2d1   : > { %v690_v41 = vadd.f32 1e-05, %v658_v11  ;;  %vm927_vm13 = vmor %vm925_vm11, %vm926_vm12 }
 0x2d2   : > { %v918_v40 = vsel %vm917_vm10, %v2609_v62, %v914_v4  ;;  %v921_v22 = vmul.f32 %v2611_v43, %v920_v63  ;;  %v1742_v46 = vpop.f32.mrf.mxu3 }
 0x2d3   : > { %2612 = vrsqrt.f32 %v690_v41  ;;  %v1040_v50 = vmul.f32 %v918_v40, %v3833_v47  ;;  %v1743_v27 = vadd.f32 %v1742_v46, %v3709_v53  ;;  %vm935_vm15 = vweird.f32 %v690_v41 }
 0x2d4   : > { %v922_v26 = vmul.f32 0.5, %v921_v22 }
 0x2d5   : > { %v1076_v34 = vmul.f32 %v3838_v29, %v1040_v50  ;;  %v1809_v49 = vpack.c.bf16 %v1743_v27, %v1743_v27 }
 0x2d6   : > { %v923_v42 = vsub.f32 1.5, %v922_v26  ;;  %v1522_v15 = vpop.f32.mrf.mxu0  ;;  %v1611_v10 = vpop.f32.mrf.mxu1 }
 0x2d7   : > { %v1112_v61 = vadd.f32 %v3847_v45, %v1076_v34  ;;  %1873 = vst [vmem:[%s3706_s26 + $0x164] sm:$0xf] %v1809_v49  ;;  %v1523_v47 = vadd.f32 %v1522_v15, %v3671_v5  ;;  %v1612_v57 = vadd.f32 %v1611_v10, %v3673_v37 }
 0x2d8   : > { %v924_v31 = vmul.f32 %v2611_v43, %v923_v42 }
 0x2d9   : > { %v2613_v36 = vpop.eup %2612  ;;  %v2363_v32 = vpack.c.bf16 %v1112_v61, %v1111_v38  ;;  %v1774_v21 = vpack.c.bf16 %v1612_v57, %v1523_v47 }
 0x2da   : > { %v930_v7 = vmul.f32 %v2613_v36, %v690_v41  ;;  %v1745_v55 = vpop.f32.mrf.mxu3  ;;  %v928_v19 = vsel %vm927_vm13, %v2611_v43, %v924_v31  ;;  %vm936_vm14 = vweird.f32 %v2613_v36 }
 0x2db   : > { %2414 = vst [vmem:[#allocation2 + $0x10] sm:$0xff] %v2363_v32   ;;  %v1746_v39 = vadd.f32 %v1745_v55, %v3709_v53  ;;  %v1041_v44 = vmul.f32 %v928_v19, %v3853_v20  ;;  %vm937_vm0 = vmor %vm935_vm15, %vm936_vm14 }
 0x2dc   : > { %v931_v30 = vmul.f32 %v2613_v36, %v930_v7  ;;  %1838 = vst [vmem:[%s3706_s26 + $0x90] sm:$0xff] %v1774_v21 }
 0x2dd   : > { %v1811_v8 = vpack.c.bf16 %v1746_v39, %v1746_v39  ;;  %v1700_v6 = vpop.f32.mrf.mxu2  ;;  %v1077_v13 = vmul.f32 %v3838_v29, %v1041_v44 }
 0x2de   : > { %v932_v52 = vmul.f32 0.5, %v931_v30  ;;  %v1701_v54 = vadd.f32 %v1700_v6, %v3709_v53  ;;  %v1524_v14 = vpop.f32.mrf.mxu0  ;;  %v1613_v9 = vpop.f32.mrf.mxu1 }
 0x2df   : > { %1875 = vst [vmem:[%s3706_s26 + $0x170] sm:$0xf] %v1811_v8  ;;  %v1525_v3 = vadd.f32 %v1524_v14, %v3671_v5  ;;  %v1614_v33 = vadd.f32 %v1613_v9, %v3673_v37  ;;  %v1113_v60 = vadd.f32 %v3847_v45, %v1077_v13 }
 0x2e0   : > { %v933_v0 = vsub.f32 1.5, %v932_v52  ;;  %v1775_v12 = vpack.c.bf16 %v1701_v54, %v1701_v54 }
 0x2e1   : > { %v1776_v62 = vpack.c.bf16 %v1614_v33, %v1525_v3 }
 0x2e2   : > { %v934_v59 = vmul.f32 %v2613_v36, %v933_v0  ;;  %v2216_v58 = vld [vmem:[#allocation2 + $0x10] sm:$0xff]  ;;  %1839 = vst [vmem:[%s3706_s26 + $0x98] sm:$0xf] %v1775_v12  ;;  %v1747_v35 = vpop.f32.mrf.mxu3 }
 0x2e3   : > { %v1748_v56 = vadd.f32 %v1747_v35, %v3709_v53  ;;  %1541 = vmatmul.bf16.gmra.mxu0 %v2216_v58  ;;  %1630 = vmatmul.bf16.gmra.mxu1 %v2216_v58  ;;  %1840 = vst [vmem:[%s3706_s26 + $0x9c] sm:$0xff] %v1776_v62 }
 0x2e4   : > { %v938_v25 = vsel %vm937_vm0, %v2613_v36, %v934_v59  ;;  %1719 = vmatmul.bf16.gmra.mxu2 %v2216_v58 }
 0x2e5   : > { %v1042_v20 = vmul.f32 %v938_v25, %v3864_v28  ;;  %v1813_v23 = vpack.c.bf16 %v1748_v56, %v1748_v56  ;;  %v1702_v24 = vpop.f32.mrf.mxu2 }
 0x2e6   : > { %v1703_v1 = vadd.f32 %v1702_v24, %v3709_v53 }
 0x2e7   : > { %v1078_v17 = vmul.f32 %v3838_v29, %v1042_v20  ;;  %1877 = vst [vmem:[%s3706_s26 + $0x17c] sm:$0xf] %v1813_v23  ;;  %v1527_v28 = vpop.f32.mrf.mxu0  ;;  %v1616_v2 = vpop.f32.mrf.mxu1 }
 0x2e8   : > { %v1777_v48 = vpack.c.bf16 %v1703_v1, %v1703_v1  ;;  %v1528_v11 = vadd.f32 %v1527_v28, %v3671_v5  ;;  %v1617_v43 = vadd.f32 %v1616_v2, %v3673_v37 }
 0x2e9   : > { %v1114_v16 = vadd.f32 %v3847_v45, %v1078_v17 }
 0x2ea   : > { %1841 = vst [vmem:[%s3706_s26 + $0xa4] sm:$0xf] %v1777_v48  ;;  %v1778_v18 = vpack.c.bf16 %v1617_v43, %v1528_v11 }
 0x2eb   : > { %v2368_v29 = vpack.c.bf16 %v1114_v16, %v1113_v60 }
 0x2ec   : > { %1842 = vst [vmem:[%s3706_s26 + $0xa8] sm:$0xff] %v1778_v18 }
 0x2ed   : > { %2415 = vst [vmem:[#allocation2 + $0x38] sm:$0xff] %v2368_v29  }
 0x2ee   : > { %v1705_v4 = vpop.f32.mrf.mxu2 }
 0x2ef   : > { %v1706_v63 = vadd.f32 %v1705_v4, %v3709_v53  ;;  %v1529_v41 = vpop.f32.mrf.mxu0  ;;  %v1618_v45 = vpop.f32.mrf.mxu1 }
 0x2f0   : > { %v1530_v40 = vadd.f32 %v1529_v41, %v3671_v5  ;;  %v1619_v22 = vadd.f32 %v1618_v45, %v3673_v37 }
 0x2f1   : > { %v1779_v51 = vpack.c.bf16 %v1706_v63, %v1706_v63 }
 0x2f2   : > { %v1780_v50 = vpack.c.bf16 %v1619_v22, %v1530_v40 }
 0x2f3   : > { %1843 = vst [vmem:[%s3706_s26 + $0xb0] sm:$0xf] %v1779_v51 }
 0x2f4   : > { %v2217_v46 = vld [vmem:[#allocation2 + $0x38] sm:$0xff]  ;;  %1844 = vst [vmem:[%s3706_s26 + $0xb4] sm:$0xff] %v1780_v50 }
 0x2f5   : > { %1546 = vmatmul.bf16.gmra.mxu0 %v2217_v46  ;;  %1635 = vmatmul.bf16.gmra.mxu1 %v2217_v46 }
 0x2f6   : > { %1724 = vmatmul.bf16.gmra.mxu2 %v2217_v46  ;;  %v1707_v26 = vpop.f32.mrf.mxu2 }
 0x2f7   : > { %v1708_v27 = vadd.f32 %v1707_v26, %v3709_v53  ;;  %v1532_v34 = vpop.f32.mrf.mxu0  ;;  %v1621_v42 = vpop.f32.mrf.mxu1 }
 0x2f8   : > { %v1533_v49 = vadd.f32 %v1532_v34, %v3671_v5  ;;  %v1622_v38 = vadd.f32 %v1621_v42, %v3673_v37 }
 0x2f9   : > { %v1781_v61 = vpack.c.bf16 %v1708_v27, %v1708_v27 }
 0x2fa   : > { %v1782_v15 = vpack.c.bf16 %v1622_v38, %v1533_v49 }
 0x2fb   : > { %1845 = vst [vmem:[%s3706_s26 + $0xbc] sm:$0xf] %v1781_v61 }
 0x2fc   : > { %1846 = vst [vmem:[%s3706_s26 + $0xc0] sm:$0xff] %v1782_v15 }
 0x2fe   : > { %v1710_v36 = vpop.f32.mrf.mxu2 }
 0x2ff   : > { %v1711_v47 = vadd.f32 %v1710_v36, %v3709_v53  ;;  %v1534_v10 = vpop.f32.mrf.mxu0  ;;  %v1623_v32 = vpop.f32.mrf.mxu1 }
 0x300   : > { %v1535_v31 = vadd.f32 %v1534_v10, %v3671_v5  ;;  %v1624_v7 = vadd.f32 %v1623_v32, %v3673_v37 }
 0x301   : > { %v1783_v57 = vpack.c.bf16 %v1711_v47, %v1711_v47 }
 0x302   : > { %v1784_v30 = vpack.c.bf16 %v1624_v7, %v1535_v31 }
 0x303   : > { %1847 = vst [vmem:[%s3706_s26 + $0xc8] sm:$0xf] %v1783_v57 }
 0x304   : > { %1848 = vst [vmem:[%s3706_s26 + $0xcc] sm:$0xff] %v1784_v30 }
 0x306   : > { %v1712_v21 = vpop.f32.mrf.mxu2 }
 0x307   : > { %v1713_v55 = vadd.f32 %v1712_v21, %v3709_v53  ;;  %v1537_v39 = vpop.f32.mrf.mxu0  ;;  %v1626_v19 = vpop.f32.mrf.mxu1 }
 0x308   : > { %v1538_v52 = vadd.f32 %v1537_v39, %v3671_v5  ;;  %v1627_v8 = vadd.f32 %v1626_v19, %v3673_v37 }
 0x309   : > { %v1785_v6 = vpack.c.bf16 %v1713_v55, %v1713_v55 }
 0x30a   : > { %v1786_v0 = vpack.c.bf16 %v1627_v8, %v1538_v52 }
 0x30b   : > { %1849 = vst [vmem:[%s3706_s26 + $0xd4] sm:$0xf] %v1785_v6 }
 0x30c   : > { %1850 = vst [vmem:[%s3706_s26 + $0xd8] sm:$0xff] %v1786_v0 }
 0x30e   : > { %v1715_v54 = vpop.f32.mrf.mxu2 }
 0x30f   : > { %v1716_v14 = vadd.f32 %v1715_v54, %v3709_v53  ;;  %v1539_v44 = vpop.f32.mrf.mxu0  ;;  %v1628_v3 = vpop.f32.mrf.mxu1 }
 0x310   : > { %v1540_v9 = vadd.f32 %v1539_v44, %v3671_v5  ;;  %v1629_v59 = vadd.f32 %v1628_v3, %v3673_v37 }
 0x311   : > { %v1787_v12 = vpack.c.bf16 %v1716_v14, %v1716_v14 }
 0x312   : > { %v1788_v33 = vpack.c.bf16 %v1629_v59, %v1540_v9 }
 0x313   : > { %1851 = vst [vmem:[%s3706_s26 + $0xe0] sm:$0xf] %v1787_v12 }
 0x314   : > { %1852 = vst [vmem:[%s3706_s26 + $0xe4] sm:$0xff] %v1788_v33 }
 0x316   : > { %v1717_v58 = vpop.f32.mrf.mxu2 }
 0x317   : > { %v1718_v25 = vadd.f32 %v1717_v58, %v3709_v53 }
 0x319   : > { %v1789_v62 = vpack.c.bf16 %v1718_v25, %v1718_v25 }
 0x31b   : > { %1853 = vst [vmem:[%s3706_s26 + $0xec] sm:$0xf] %v1789_v62 }
 0x360   : > { %v1542_v35 = vpop.f32.mrf.mxu0  ;;  %v1631_v13 = vpop.f32.mrf.mxu1 }
 0x361   : > { %v1543_v20 = vadd.f32 %v1542_v35, %v3671_v5  ;;  %v1632_v56 = vadd.f32 %v1631_v13, %v3673_v37 }
 0x363   : > { %v1790_v17 = vpack.c.bf16 %v1632_v56, %v1543_v20 }
 0x365   : > { %1854 = vst [vmem:[%s3706_s26 + $0xf0] sm:$0xff] %v1790_v17 }
 0x367   : > { %v1720_v23 = vpop.f32.mrf.mxu2 }
 0x368   : > { %v1721_v24 = vadd.f32 %v1720_v23, %v3709_v53  ;;  %v1544_v1 = vpop.f32.mrf.mxu0  ;;  %v1633_v60 = vpop.f32.mrf.mxu1 }
 0x369   : > { %v1545_v16 = vadd.f32 %v1544_v1, %v3671_v5  ;;  %v1634_v28 = vadd.f32 %v1633_v60, %v3673_v37 }
 0x36a   : > { %v1791_v2 = vpack.c.bf16 %v1721_v24, %v1721_v24 }
 0x36b   : > { %v1792_v48 = vpack.c.bf16 %v1634_v28, %v1545_v16 }
 0x36c   : > { %1855 = vst [vmem:[%s3706_s26 + $0xf8] sm:$0xf] %v1791_v2 }
 0x36d   : > { %1856 = vst [vmem:[%s3706_s26 + $0xfc] sm:$0xff] %v1792_v48 }
 0x36f   : > { %v1722_v11 = vpop.f32.mrf.mxu2 }
 0x370   : > { %v1723_v43 = vadd.f32 %v1722_v11, %v3709_v53 }
 0x372   : > { %v1547_v29 = vpop.f32.mrf.mxu0  ;;  %v1636_v18 = vpop.f32.mrf.mxu1  ;;  %v1793_v4 = vpack.c.bf16 %v1723_v43, %v1723_v43 }
 0x373   : > { %v1548_v63 = vadd.f32 %v1547_v29, %v3671_v5  ;;  %v1637_v41 = vadd.f32 %v1636_v18, %v3673_v37 }
 0x374   : > { %1857 = vst [vmem:[%s3706_s26 + $0x104] sm:$0xf] %v1793_v4 }
 0x375   : > { %v1794_v45 = vpack.c.bf16 %v1637_v41, %v1548_v63 }
 0x377   : > { %1858 = vst [vmem:[%s3706_s26 + $0x108] sm:$0xff] %v1794_v45 }
 0x379   : > { %v1725_v40 = vpop.f32.mrf.mxu2 }
 0x37a   : > { %v1726_v22 = vadd.f32 %v1725_v40, %v3709_v53  ;;  %v1549_v51 = vpop.f32.mrf.mxu0  ;;  %v1638_v50 = vpop.f32.mrf.mxu1 }
 0x37b   : > { %v1550_v46 = vadd.f32 %v1549_v51, %v3671_v5  ;;  %v1639_v26 = vadd.f32 %v1638_v50, %v3673_v37 }
 0x37c   : > { %v1795_v27 = vpack.c.bf16 %v1726_v22, %v1726_v22 }
 0x37d   : > { %v1796_v34 = vpack.c.bf16 %v1639_v26, %v1550_v46 }
 0x37e   : > { %1859 = vst [vmem:[%s3706_s26 + $0x110] sm:$0xf] %v1795_v27 }
 0x37f   : > { %1860 = vst [vmem:[%s3706_s26 + $0x114] sm:$0xff] %v1796_v34 }
 0x381   : > { %v1727_v42 = vpop.f32.mrf.mxu2 }
 0x382   : > { %v1728_v49 = vadd.f32 %v1727_v42, %v3709_v53 }
 0x384   : > { %v1797_v38 = vpack.c.bf16 %v1728_v49, %v1728_v49 }
 0x386   : > { %1861 = vst [vmem:[%s3706_s26 + $0x11c] sm:$0xf] %v1797_v38 }
 0x387   : > { %2763 = shalt.err (!%p2760_p0)
}
 0x388   : > { %s2836_s12 = smov 192   ;;  %s2837_s1 = smov 12  }
 0x389   : > { %2460 = dma.vmem_to_hbm [thread:$0]  (%p2957_p3), %s1895_s21, 6144, %s1897_s24, %s1879_s25, %s2836_s12, %s2836_s12, %s2837_s1  }
 0x38a PF: > { %s1911_s2 = sand.u32 1, %s2806_s18   ;;  %p2477_p5 = pnand %p2031_p9, %p2917_p6 }
 0x38b   : > { %s1912_s3 = scalar_lea.sflag [#allocation5], %s1911_s2 }
 0x38c   : > { %p2478_p7 = pneg %p2477_p5 }
 0x38e   : > { %2801 = dma.done.wait (%p2478_p7), %s1912_s3, 6144  }
 0x38f   : > { %2803 = vsyncadd (%p2478_p7), %s1912_s3, 4294961152  ;;  %s23_s23 = sadd.s32 1, %s2826_s23   ;;  %s4134_s18 = smov %s2810_s19 }
 0x390   : > { %p20_p10 = scmp.ge.s32.totalorder %s23_s23, 4   ;;  %s4135_s19 = smov %s2814_s20 }
 0x391   : > { %s4136_s20 = smov %s2973_s27  ;;  %s4137_s21 = smov %s2822_s22 }
 0x392   : > { %s4138_s22 = smov %s4140_s15  ;;  %22 = sbr.rel (!%p20_p10) target bundleno = 12 (0xc), region = 105 }
 0x397   :  { %1918 = vsyncpa [#allocation4], 1 }
 0x398   :  { %1920 = vsyncpa [#allocation4 + $0x1], 1 }
 0x399   :  { %1921 = vsyncpa [#allocation7], 1 }
 0x39a   :  { %1922 = vsyncpa [#allocation10], 1 }
 0x39b   :  { %1923 = vsyncpa [#allocation5], 1 }
 0x39c   :  { %1925 = vsyncpa [#allocation5 + $0x1], 1 }

</bundles_post_ra>
